<compile_context>
chip_gen: v5e
topology: v5e:2x2
jax: 0.10.0
libtpu: 0.0.40
codegen_flags: <defaults>
</compile_context>

<pallas_src>
import functools
import math

import jax
import jax.numpy as jnp
from jax.experimental import pallas as pl
from jax.experimental.pallas import tpu as pltpu


# --------------------------------------------------------------------------
# Pallas kernel
# --------------------------------------------------------------------------
def rainbow_kernel(x_ref, w1_ref, b1_ref, w2_ref, b2_ref, w3_ref, b3_ref,
                   wh_ref, bh_ref, wo_ref, bo_ref, sup_ref, q_ref,
                   *, out_dim, atom_size):
    f32 = jnp.float32
    bf16 = jnp.bfloat16
    relu = lambda v: jnp.maximum(v, 0.0)

    def mm(a, w_ref, b_ref):
        # bf16 MXU inputs, f32 accumulation, f32 bias add / elementwise.
        return jnp.dot(a.astype(bf16), w_ref[...],
                       preferred_element_type=f32) + b_ref[...]

    # feature_layer: Linear(in,512) -> ReLU -> Linear(512,256) -> ReLU
    #                -> Linear(256,128) -> ReLU
    h = relu(mm(x_ref[...], w1_ref, b1_ref))          # (B, 512)
    h = relu(mm(h, w2_ref, b2_ref))                   # (B, 256)
    feat = relu(mm(h, w3_ref, b3_ref))                # (B, 128)

    # Fused dueling hidden heads: one matmul -> [adv_hid | val_hid]  (B, 512).
    heads = relu(mm(feat, wh_ref, bh_ref))

    # Fused (block-diagonal) output heads: one matmul ->
    # [advantage (out_dim*atom) | value (atom)]  (B, out_dim*atom + atom).
    out = mm(heads, wo_ref, bo_ref)
    na = out_dim * atom_size
    advantage = out[:, :na]
    value = out[:, na:na + atom_size]

    # advantage.mean over actions via static per-action lane slices
    # (out_dim*atom_size = 32 lives inside one lane tile).
    adv_slices = [advantage[:, a * atom_size:(a + 1) * atom_size]
                  for a in range(out_dim)]
    adv_sum = adv_slices[0]
    for a in range(1, out_dim):
        adv_sum = adv_sum + adv_slices[a]
    base = value - adv_sum * (1.0 / out_dim)          # hoisted loop invariant

    sup = sup_ref[...]                                # (1, atom)

    # per-action softmax over atoms, clamp(0.001), expectation over support
    q_cols = []
    for a in range(out_dim):
        qa = base + adv_slices[a]                     # (B, atom)
        m = jnp.max(qa, axis=-1, keepdims=True)
        e = jnp.exp(qa - m)
        inv = pl.reciprocal(jnp.sum(e, axis=-1, keepdims=True), approx=True)
        dist = jnp.maximum(e * inv, 0.001)
        q_cols.append(jnp.sum(dist * sup, axis=-1, keepdims=True))  # (B, 1)

    # single store of the full (B, out_dim) tile
    q_ref[...] = jnp.concatenate(q_cols, axis=-1)


# --------------------------------------------------------------------------
# Wrapper
# --------------------------------------------------------------------------
def rainbow_forward(x, packed_params, support, out_dim, atom_size,
                    block_batch=256):
    b, in_dim = x.shape
    tm = min(b, block_batch)                          # 256 matches v6e/v7x MXU tile
    grid = (pl.cdiv(b, tm),)

    sup2 = support.reshape(1, atom_size).astype(jnp.float32)
    resident_inputs = list(packed_params) + [sup2]    # all 2-D, VMEM-resident

    def resident_spec(arr):
        return pl.BlockSpec(arr.shape, lambda i: (0, 0))

    in_specs = ([pl.BlockSpec((tm, in_dim), lambda i: (i, 0))]
                + [resident_spec(p) for p in resident_inputs])
    out_specs = pl.BlockSpec((tm, out_dim), lambda i: (i, 0))

    n_out = out_dim * atom_size + atom_size
    flops = 2 * b * (in_dim * 512 + 512 * 256 + 256 * 128
                     + 128 * 512 + 512 * n_out)
    transcendentals = b * out_dim * (atom_size + 1)   # exp + approx reciprocal
    bytes_accessed = (int(x.size) * x.dtype.itemsize
                      + sum(int(p.size) * p.dtype.itemsize
                            for p in resident_inputs)
                      + b * out_dim * 4)

    kernel = functools.partial(rainbow_kernel,
                               out_dim=out_dim, atom_size=atom_size)
    return pl.pallas_call(
        kernel,
        out_shape=jax.ShapeDtypeStruct((b, out_dim), jnp.float32),
        grid=grid,
        in_specs=in_specs,
        out_specs=out_specs,
        compiler_params=pltpu.CompilerParams(
            dimension_semantics=("parallel",)),       # batch axis -> both TCs (v7x)
        cost_estimate=pl.CostEstimate(flops=flops,
                                      transcendentals=transcendentals,
                                      bytes_accessed=bytes_accessed),
    )(x, *resident_inputs)


# --------------------------------------------------------------------------
# Deterministic parameter construction (mirrors PyTorch init shapes/rules)
# --------------------------------------------------------------------------
def _scale_noise(key, size):
    x = jax.random.normal(key, (size,), jnp.float32)
    return jnp.sign(x) * jnp.sqrt(jnp.abs(x))


def init_linear(key, fan_in, fan_out):
    kw, kb = jax.random.split(key)
    bound = 1.0 / math.sqrt(fan_in)
    w = jax.random.uniform(kw, (fan_in, fan_out), jnp.float32, -bound, bound)
    b = jax.random.uniform(kb, (1, fan_out), jnp.float32, -bound, bound)
    return w, b


def init_noisy(key, fan_in, fan_out, std_init=0.5):
    kmw, kmb, kei, keo = jax.random.split(key, 4)
    mu_range = 1.0 / math.sqrt(fan_in)
    w_mu = jax.random.uniform(kmw, (fan_in, fan_out), jnp.float32, -mu_range, mu_range)
    b_mu = jax.random.uniform(kmb, (1, fan_out), jnp.float32, -mu_range, mu_range)
    w_sigma = jnp.full((fan_in, fan_out), std_init / math.sqrt(fan_in), jnp.float32)
    b_sigma = jnp.full((1, fan_out), std_init / math.sqrt(fan_out), jnp.float32)
    eps_in = _scale_noise(kei, fan_in)
    eps_out = _scale_noise(keo, fan_out)
    w_eps = jnp.outer(eps_in, eps_out)     # == torch outer(eps_out, eps_in).T
    b_eps = eps_out[None, :]
    # effective weights used by NoisyLinear.forward
    return w_mu + w_sigma * w_eps, b_mu + b_sigma * b_eps


def build_params(key, in_dim, out_dim, atom_size):
    keys = jax.random.split(key, 7)
    w1, b1 = init_linear(keys[0], in_dim, 512)
    w2, b2 = init_linear(keys[1], 512, 256)
    w3, b3 = init_linear(keys[2], 256, 128)
    wah, bah = init_noisy(keys[3], 128, 256)
    wa, ba = init_noisy(keys[4], 256, out_dim * atom_size)
    wvh, bvh = init_noisy(keys[5], 128, 256)
    wv, bv = init_noisy(keys[6], 256, atom_size)
    return [w1, b1, w2, b2, w3, b3, wah, bah, wa, ba, wvh, bvh, wv, bv]


def pack_params(raw):
    """Fold raw (f32, unfused) params into the kernel's fused bf16 layout."""
    w1, b1, w2, b2, w3, b3, wah, bah, wa, ba, wvh, bvh, wv, bv = raw
    bf16 = jnp.bfloat16
    # fused hidden heads: (128, 512) = [wah | wvh]
    wh = jnp.concatenate([wah, wvh], axis=1)
    bh = jnp.concatenate([bah, bvh], axis=1)
    # block-diagonal fused output heads: (512, out_dim*atom + atom)
    na, nv = wa.shape[1], wv.shape[1]
    wo = jnp.zeros((wh.shape[1], na + nv), jnp.float32)
    wo = wo.at[:wa.shape[0], :na].set(wa)
    wo = wo.at[wa.shape[0]:, na:].set(wv)
    bo = jnp.concatenate([ba, bv], axis=1)
    return [w1.astype(bf16), b1, w2.astype(bf16), b2, w3.astype(bf16), b3,
            wh.astype(bf16), bh, wo.astype(bf16), bo]


# --------------------------------------------------------------------------
# Pure-JAX reference (mirrors Network.forward / Network.dist)
# --------------------------------------------------------------------------
def reference_forward(x, raw, support, out_dim, atom_size, bf16_weights=False):
    w1, b1, w2, b2, w3, b3, wah, bah, wa, ba, wvh, bvh, wv, bv = raw
    cast = (lambda a: a.astype(jnp.bfloat16)) if bf16_weights else (lambda a: a)

    def mm(a, w, b):
        return jnp.dot(cast(a), cast(w), preferred_element_type=jnp.float32) + b

    relu = lambda v: jnp.maximum(v, 0.0)
    feat = relu(mm(relu(mm(relu(mm(x, w1, b1)), w2, b2)), w3, b3))
    adv_hid = relu(mm(feat, wah, bah))
    val_hid = relu(mm(feat, wvh, bvh))
    advantage = mm(adv_hid, wa, ba).reshape(-1, out_dim, atom_size)
    value = mm(val_hid, wv, bv).reshape(-1, 1, atom_size)
    q_atoms = value + advantage - advantage.mean(axis=1, keepdims=True)
    dist = jax.nn.softmax(q_atoms, axis=-1)
    dist = jnp.clip(dist, 0.001, None)
    return jnp.sum(dist * support, axis=2)


# --------------------------------------------------------------------------
if __name__ == "__main__":
    in_dim, out_dim, atom_size, batch = 16, 4, 8, 8

    key = jax.random.PRNGKey(0)
    kx, kp = jax.random.split(key)
    x = jax.random.normal(kx, (batch, in_dim), jnp.float32)
    raw_params = build_params(kp, in_dim, out_dim, atom_size)
    packed = pack_params(raw_params)
    support = jnp.linspace(-10.0, 10.0, atom_size, dtype=jnp.float32)

    q = rainbow_forward(x, packed, support, out_dim, atom_size)
    q = jax.block_until_ready(q)
    assert q.shape == (batch, out_dim), q.shape

    # exact-math reference (same bf16 weight/activation quantization, f32 acc)
    q_bf = reference_forward(x, raw_params, support, out_dim, atom_size,
                             bf16_weights=True)
    assert jnp.allclose(q, q_bf, rtol=2e-2, atol=2e-2), (q, q_bf)

    # coarse sanity check against the full-precision module semantics
    q_f32 = reference_forward(x, raw_params, support, out_dim, atom_size,
                              bf16_weights=False)
    assert jnp.allclose(q, q_f32, rtol=0.0, atol=0.5), (q, q_f32)

    print("KERNEL_OK")
</pallas_src>

<mosaic_0001>
module attributes {stable_mosaic.version = 11 : i64} {
  func.func @rainbow_kernel(%arg0: i32, %arg1: memref<8x16xf32, #tpu.memory_space<vmem>>, %arg2: memref<16x512xbf16, #tpu.memory_space<vmem>>, %arg3: memref<1x512xf32, #tpu.memory_space<vmem>>, %arg4: memref<512x256xbf16, #tpu.memory_space<vmem>>, %arg5: memref<1x256xf32, #tpu.memory_space<vmem>>, %arg6: memref<256x128xbf16, #tpu.memory_space<vmem>>, %arg7: memref<1x128xf32, #tpu.memory_space<vmem>>, %arg8: memref<128x512xbf16, #tpu.memory_space<vmem>>, %arg9: memref<1x512xf32, #tpu.memory_space<vmem>>, %arg10: memref<512x40xbf16, #tpu.memory_space<vmem>>, %arg11: memref<1x40xf32, #tpu.memory_space<vmem>>, %arg12: memref<1x8xf32, #tpu.memory_space<vmem>>, %arg13: memref<8x4xf32, #tpu.memory_space<vmem>>) attributes {dimension_semantics = [#tpu.dimension_semantics<parallel>], iteration_bounds = array<i64: 1>, scalar_prefetch = 0 : i64, scratch_operands = 0 : i64, tpu.core_type = #tpu.core_type<tc>, window_params = [{transform_indices = @transform_0, window_bounds = array<i64: 8, 16>}, {pipeline_mode = #tpu.pipeline_mode<synchronous>, transform_indices = @transform_1, window_bounds = array<i64: 16, 512>}, {pipeline_mode = #tpu.pipeline_mode<synchronous>, transform_indices = @transform_2, window_bounds = array<i64: 1, 512>}, {pipeline_mode = #tpu.pipeline_mode<synchronous>, transform_indices = @transform_3, window_bounds = array<i64: 512, 256>}, {pipeline_mode = #tpu.pipeline_mode<synchronous>, transform_indices = @transform_4, window_bounds = array<i64: 1, 256>}, {pipeline_mode = #tpu.pipeline_mode<synchronous>, transform_indices = @transform_5, window_bounds = array<i64: 256, 128>}, {pipeline_mode = #tpu.pipeline_mode<synchronous>, transform_indices = @transform_6, window_bounds = array<i64: 1, 128>}, {pipeline_mode = #tpu.pipeline_mode<synchronous>, transform_indices = @transform_7, window_bounds = array<i64: 128, 512>}, {pipeline_mode = #tpu.pipeline_mode<synchronous>, transform_indices = @transform_8, window_bounds = array<i64: 1, 512>}, {pipeline_mode = #tpu.pipeline_mode<synchronous>, transform_indices = @transform_9, window_bounds = array<i64: 512, 40>}, {pipeline_mode = #tpu.pipeline_mode<synchronous>, transform_indices = @transform_10, window_bounds = array<i64: 1, 40>}, {pipeline_mode = #tpu.pipeline_mode<synchronous>, transform_indices = @transform_11, window_bounds = array<i64: 1, 8>}, {transform_indices = @transform_12, window_bounds = array<i64: 8, 4>}]} {
    %c0 = arith.constant 0 : index
    %c0_0 = arith.constant 0 : index
    %0 = vector.load %arg1[%c0, %c0_0] : memref<8x16xf32, #tpu.memory_space<vmem>>, vector<8x16xf32>
    %1 = arith.truncf %0 : vector<8x16xf32> to vector<8x16xbf16>
    %c0_1 = arith.constant 0 : index
    %c0_2 = arith.constant 0 : index
    %2 = vector.load %arg2[%c0_1, %c0_2] : memref<16x512xbf16, #tpu.memory_space<vmem>>, vector<16x512xbf16>
    %cst = arith.constant dense<0.000000e+00> : vector<8x512xf32>
    %3 = tpu.matmul %1, %2, %cst {dimension_numbers = #tpu.dot_dimension_numbers<[1], [0], [0], [1], [0, 0, 1, 1], [], []>} : vector<8x16xbf16>, vector<16x512xbf16>, vector<8x512xf32> -> vector<8x512xf32>
    %c0_3 = arith.constant 0 : index
    %c0_4 = arith.constant 0 : index
    %4 = vector.load %arg3[%c0_3, %c0_4] : memref<1x512xf32, #tpu.memory_space<vmem>>, vector<1x512xf32>
    %5 = vector.broadcast %4 : vector<1x512xf32> to vector<8x512xf32>
    %6 = arith.addf %3, %5 : vector<8x512xf32>
    %cst_5 = arith.constant 0.000000e+00 : f32
    %7 = vector.broadcast %cst_5 : f32 to vector<8x512xf32>
    %8 = arith.maximumf %6, %7 : vector<8x512xf32>
    %9 = arith.truncf %8 : vector<8x512xf32> to vector<8x512xbf16>
    %c0_6 = arith.constant 0 : index
    %c0_7 = arith.constant 0 : index
    %10 = vector.load %arg4[%c0_6, %c0_7] : memref<512x256xbf16, #tpu.memory_space<vmem>>, vector<512x256xbf16>
    %cst_8 = arith.constant dense<0.000000e+00> : vector<8x256xf32>
    %11 = tpu.matmul %9, %10, %cst_8 {dimension_numbers = #tpu.dot_dimension_numbers<[1], [0], [0], [1], [0, 0, 1, 1], [], []>} : vector<8x512xbf16>, vector<512x256xbf16>, vector<8x256xf32> -> vector<8x256xf32>
    %c0_9 = arith.constant 0 : index
    %c0_10 = arith.constant 0 : index
    %12 = vector.load %arg5[%c0_9, %c0_10] : memref<1x256xf32, #tpu.memory_space<vmem>>, vector<1x256xf32>
    %13 = vector.broadcast %12 : vector<1x256xf32> to vector<8x256xf32>
    %14 = arith.addf %11, %13 : vector<8x256xf32>
    %cst_11 = arith.constant 0.000000e+00 : f32
    %15 = vector.broadcast %cst_11 : f32 to vector<8x256xf32>
    %16 = arith.maximumf %14, %15 : vector<8x256xf32>
    %17 = arith.truncf %16 : vector<8x256xf32> to vector<8x256xbf16>
    %c0_12 = arith.constant 0 : index
    %c0_13 = arith.constant 0 : index
    %18 = vector.load %arg6[%c0_12, %c0_13] : memref<256x128xbf16, #tpu.memory_space<vmem>>, vector<256x128xbf16>
    %cst_14 = arith.constant dense<0.000000e+00> : vector<8x128xf32>
    %19 = tpu.matmul %17, %18, %cst_14 {dimension_numbers = #tpu.dot_dimension_numbers<[1], [0], [0], [1], [0, 0, 1, 1], [], []>} : vector<8x256xbf16>, vector<256x128xbf16>, vector<8x128xf32> -> vector<8x128xf32>
    %c0_15 = arith.constant 0 : index
    %c0_16 = arith.constant 0 : index
    %20 = vector.load %arg7[%c0_15, %c0_16] : memref<1x128xf32, #tpu.memory_space<vmem>>, vector<1x128xf32>
    %21 = vector.broadcast %20 : vector<1x128xf32> to vector<8x128xf32>
    %22 = arith.addf %19, %21 : vector<8x128xf32>
    %cst_17 = arith.constant 0.000000e+00 : f32
    %23 = vector.broadcast %cst_17 : f32 to vector<8x128xf32>
    %24 = arith.maximumf %22, %23 : vector<8x128xf32>
    %25 = arith.truncf %24 : vector<8x128xf32> to vector<8x128xbf16>
    %c0_18 = arith.constant 0 : index
    %c0_19 = arith.constant 0 : index
    %26 = vector.load %arg8[%c0_18, %c0_19] : memref<128x512xbf16, #tpu.memory_space<vmem>>, vector<128x512xbf16>
    %cst_20 = arith.constant dense<0.000000e+00> : vector<8x512xf32>
    %27 = tpu.matmul %25, %26, %cst_20 {dimension_numbers = #tpu.dot_dimension_numbers<[1], [0], [0], [1], [0, 0, 1, 1], [], []>} : vector<8x128xbf16>, vector<128x512xbf16>, vector<8x512xf32> -> vector<8x512xf32>
    %c0_21 = arith.constant 0 : index
    %c0_22 = arith.constant 0 : index
    %28 = vector.load %arg9[%c0_21, %c0_22] : memref<1x512xf32, #tpu.memory_space<vmem>>, vector<1x512xf32>
    %29 = vector.broadcast %28 : vector<1x512xf32> to vector<8x512xf32>
    %30 = arith.addf %27, %29 : vector<8x512xf32>
    %cst_23 = arith.constant 0.000000e+00 : f32
    %31 = vector.broadcast %cst_23 : f32 to vector<8x512xf32>
    %32 = arith.maximumf %30, %31 : vector<8x512xf32>
    %33 = arith.truncf %32 : vector<8x512xf32> to vector<8x512xbf16>
    %c0_24 = arith.constant 0 : index
    %c0_25 = arith.constant 0 : index
    %34 = vector.load %arg10[%c0_24, %c0_25] : memref<512x40xbf16, #tpu.memory_space<vmem>>, vector<512x40xbf16>
    %cst_26 = arith.constant dense<0.000000e+00> : vector<8x40xf32>
    %35 = tpu.matmul %33, %34, %cst_26 {dimension_numbers = #tpu.dot_dimension_numbers<[1], [0], [0], [1], [0, 0, 1, 1], [], []>} : vector<8x512xbf16>, vector<512x40xbf16>, vector<8x40xf32> -> vector<8x40xf32>
    %c0_27 = arith.constant 0 : index
    %c0_28 = arith.constant 0 : index
    %36 = vector.load %arg11[%c0_27, %c0_28] : memref<1x40xf32, #tpu.memory_space<vmem>>, vector<1x40xf32>
    %37 = vector.broadcast %36 : vector<1x40xf32> to vector<8x40xf32>
    %38 = arith.addf %35, %37 : vector<8x40xf32>
    %39 = vector.extract_strided_slice %38 {offsets = [0, 0], sizes = [8, 32], strides = [1, 1]} : vector<8x40xf32> to vector<8x32xf32>
    %40 = vector.extract_strided_slice %38 {offsets = [0, 32], sizes = [8, 8], strides = [1, 1]} : vector<8x40xf32> to vector<8x8xf32>
    %41 = vector.extract_strided_slice %39 {offsets = [0, 0], sizes = [8, 8], strides = [1, 1]} : vector<8x32xf32> to vector<8x8xf32>
    %42 = vector.extract_strided_slice %39 {offsets = [0, 8], sizes = [8, 8], strides = [1, 1]} : vector<8x32xf32> to vector<8x8xf32>
    %43 = vector.extract_strided_slice %39 {offsets = [0, 16], sizes = [8, 8], strides = [1, 1]} : vector<8x32xf32> to vector<8x8xf32>
    %44 = vector.extract_strided_slice %39 {offsets = [0, 24], sizes = [8, 8], strides = [1, 1]} : vector<8x32xf32> to vector<8x8xf32>
    %45 = arith.addf %41, %42 : vector<8x8xf32>
    %46 = arith.addf %45, %43 : vector<8x8xf32>
    %47 = arith.addf %46, %44 : vector<8x8xf32>
    %cst_29 = arith.constant 2.500000e-01 : f32
    %48 = vector.broadcast %cst_29 : f32 to vector<8x8xf32>
    %49 = arith.mulf %47, %48 : vector<8x8xf32>
    %50 = arith.subf %40, %49 : vector<8x8xf32>
    %c0_30 = arith.constant 0 : index
    %c0_31 = arith.constant 0 : index
    %51 = vector.load %arg12[%c0_30, %c0_31] : memref<1x8xf32, #tpu.memory_space<vmem>>, vector<1x8xf32>
    %52 = arith.addf %50, %41 : vector<8x8xf32>
    %cst_32 = arith.constant dense<0xFF800000> : vector<8xf32>
    %53 = vector.multi_reduction <maximumf>, %52, %cst_32 [1] : vector<8x8xf32> to vector<8xf32>
    %54 = vector.shape_cast %53 : vector<8xf32> to vector<8x1xf32>
    %55 = vector.broadcast %54 : vector<8x1xf32> to vector<8x8xf32>
    %56 = arith.subf %52, %55 : vector<8x8xf32>
    %57 = math.exp %56 : vector<8x8xf32>
    %cst_33 = arith.constant dense<0.000000e+00> : vector<8xf32>
    %58 = vector.multi_reduction <add>, %57, %cst_33 [1] : vector<8x8xf32> to vector<8xf32>
    %59 = vector.shape_cast %58 : vector<8xf32> to vector<8x1xf32>
    %60 = tpu.reciprocal %59 {approx = true} : vector<8x1xf32> -> vector<8x1xf32>
    %61 = vector.broadcast %60 : vector<8x1xf32> to vector<8x8xf32>
    %62 = arith.mulf %57, %61 : vector<8x8xf32>
    %cst_34 = arith.constant 1.000000e-03 : f32
    %63 = vector.broadcast %cst_34 : f32 to vector<8x8xf32>
    %64 = arith.maximumf %62, %63 : vector<8x8xf32>
    %65 = vector.broadcast %51 : vector<1x8xf32> to vector<8x8xf32>
    %66 = arith.mulf %64, %65 : vector<8x8xf32>
    %cst_35 = arith.constant dense<0.000000e+00> : vector<8xf32>
    %67 = vector.multi_reduction <add>, %66, %cst_35 [1] : vector<8x8xf32> to vector<8xf32>
    %68 = vector.shape_cast %67 : vector<8xf32> to vector<8x1xf32>
    %69 = arith.addf %50, %42 : vector<8x8xf32>
    %cst_36 = arith.constant dense<0xFF800000> : vector<8xf32>
    %70 = vector.multi_reduction <maximumf>, %69, %cst_36 [1] : vector<8x8xf32> to vector<8xf32>
    %71 = vector.shape_cast %70 : vector<8xf32> to vector<8x1xf32>
    %72 = vector.broadcast %71 : vector<8x1xf32> to vector<8x8xf32>
    %73 = arith.subf %69, %72 : vector<8x8xf32>
    %74 = math.exp %73 : vector<8x8xf32>
    %cst_37 = arith.constant dense<0.000000e+00> : vector<8xf32>
    %75 = vector.multi_reduction <add>, %74, %cst_37 [1] : vector<8x8xf32> to vector<8xf32>
    %76 = vector.shape_cast %75 : vector<8xf32> to vector<8x1xf32>
    %77 = tpu.reciprocal %76 {approx = true} : vector<8x1xf32> -> vector<8x1xf32>
    %78 = vector.broadcast %77 : vector<8x1xf32> to vector<8x8xf32>
    %79 = arith.mulf %74, %78 : vector<8x8xf32>
    %cst_38 = arith.constant 1.000000e-03 : f32
    %80 = vector.broadcast %cst_38 : f32 to vector<8x8xf32>
    %81 = arith.maximumf %79, %80 : vector<8x8xf32>
    %82 = vector.broadcast %51 : vector<1x8xf32> to vector<8x8xf32>
    %83 = arith.mulf %81, %82 : vector<8x8xf32>
    %cst_39 = arith.constant dense<0.000000e+00> : vector<8xf32>
    %84 = vector.multi_reduction <add>, %83, %cst_39 [1] : vector<8x8xf32> to vector<8xf32>
    %85 = vector.shape_cast %84 : vector<8xf32> to vector<8x1xf32>
    %86 = arith.addf %50, %43 : vector<8x8xf32>
    %cst_40 = arith.constant dense<0xFF800000> : vector<8xf32>
    %87 = vector.multi_reduction <maximumf>, %86, %cst_40 [1] : vector<8x8xf32> to vector<8xf32>
    %88 = vector.shape_cast %87 : vector<8xf32> to vector<8x1xf32>
    %89 = vector.broadcast %88 : vector<8x1xf32> to vector<8x8xf32>
    %90 = arith.subf %86, %89 : vector<8x8xf32>
    %91 = math.exp %90 : vector<8x8xf32>
    %cst_41 = arith.constant dense<0.000000e+00> : vector<8xf32>
    %92 = vector.multi_reduction <add>, %91, %cst_41 [1] : vector<8x8xf32> to vector<8xf32>
    %93 = vector.shape_cast %92 : vector<8xf32> to vector<8x1xf32>
    %94 = tpu.reciprocal %93 {approx = true} : vector<8x1xf32> -> vector<8x1xf32>
    %95 = vector.broadcast %94 : vector<8x1xf32> to vector<8x8xf32>
    %96 = arith.mulf %91, %95 : vector<8x8xf32>
    %cst_42 = arith.constant 1.000000e-03 : f32
    %97 = vector.broadcast %cst_42 : f32 to vector<8x8xf32>
    %98 = arith.maximumf %96, %97 : vector<8x8xf32>
    %99 = vector.broadcast %51 : vector<1x8xf32> to vector<8x8xf32>
    %100 = arith.mulf %98, %99 : vector<8x8xf32>
    %cst_43 = arith.constant dense<0.000000e+00> : vector<8xf32>
    %101 = vector.multi_reduction <add>, %100, %cst_43 [1] : vector<8x8xf32> to vector<8xf32>
    %102 = vector.shape_cast %101 : vector<8xf32> to vector<8x1xf32>
    %103 = arith.addf %50, %44 : vector<8x8xf32>
    %cst_44 = arith.constant dense<0xFF800000> : vector<8xf32>
    %104 = vector.multi_reduction <maximumf>, %103, %cst_44 [1] : vector<8x8xf32> to vector<8xf32>
    %105 = vector.shape_cast %104 : vector<8xf32> to vector<8x1xf32>
    %106 = vector.broadcast %105 : vector<8x1xf32> to vector<8x8xf32>
    %107 = arith.subf %103, %106 : vector<8x8xf32>
    %108 = math.exp %107 : vector<8x8xf32>
    %cst_45 = arith.constant dense<0.000000e+00> : vector<8xf32>
    %109 = vector.multi_reduction <add>, %108, %cst_45 [1] : vector<8x8xf32> to vector<8xf32>
    %110 = vector.shape_cast %109 : vector<8xf32> to vector<8x1xf32>
    %111 = tpu.reciprocal %110 {approx = true} : vector<8x1xf32> -> vector<8x1xf32>
    %112 = vector.broadcast %111 : vector<8x1xf32> to vector<8x8xf32>
    %113 = arith.mulf %108, %112 : vector<8x8xf32>
    %cst_46 = arith.constant 1.000000e-03 : f32
    %114 = vector.broadcast %cst_46 : f32 to vector<8x8xf32>
    %115 = arith.maximumf %113, %114 : vector<8x8xf32>
    %116 = vector.broadcast %51 : vector<1x8xf32> to vector<8x8xf32>
    %117 = arith.mulf %115, %116 : vector<8x8xf32>
    %cst_47 = arith.constant dense<0.000000e+00> : vector<8xf32>
    %118 = vector.multi_reduction <add>, %117, %cst_47 [1] : vector<8x8xf32> to vector<8xf32>
    %119 = vector.shape_cast %118 : vector<8xf32> to vector<8x1xf32>
    %120 = tpu.concatenate %68, %85, %102, %119 in 1 : vector<8x1xf32>, vector<8x1xf32>, vector<8x1xf32>, vector<8x1xf32> -> vector<8x4xf32>
    %c0_48 = arith.constant 0 : index
    %c0_49 = arith.constant 0 : index
    %121 = vector.load %arg13[%c0_48, %c0_49] : memref<8x4xf32, #tpu.memory_space<vmem>>, vector<8x4xf32>
    tpu.vector_store %arg13[%c0_48, %c0_49], %120 {strides = array<i32>} : memref<8x4xf32, #tpu.memory_space<vmem>>, vector<8x4xf32>,
    return
  }
  func.func @transform_0(%arg0: i32) -> (i32, i32) {
    %c0_i32 = arith.constant 0 : i32
    %c0_i32_0 = arith.constant 0 : i32
    return %arg0, %c0_i32 : i32, i32
  }
  func.func @transform_1(%arg0: i32) -> (i32, i32) {
    %c0_i32 = arith.constant 0 : i32
    %c0_i32_0 = arith.constant 0 : i32
    %c0_i32_1 = arith.constant 0 : i32
    return %c0_i32, %c0_i32_0 : i32, i32
  }
  func.func @transform_2(%arg0: i32) -> (i32, i32) {
    %c0_i32 = arith.constant 0 : i32
    %c0_i32_0 = arith.constant 0 : i32
    %c0_i32_1 = arith.constant 0 : i32
    return %c0_i32, %c0_i32_0 : i32, i32
  }
  func.func @transform_3(%arg0: i32) -> (i32, i32) {
    %c0_i32 = arith.constant 0 : i32
    %c0_i32_0 = arith.constant 0 : i32
    %c0_i32_1 = arith.constant 0 : i32
    return %c0_i32, %c0_i32_0 : i32, i32
  }
  func.func @transform_4(%arg0: i32) -> (i32, i32) {
    %c0_i32 = arith.constant 0 : i32
    %c0_i32_0 = arith.constant 0 : i32
    %c0_i32_1 = arith.constant 0 : i32
    return %c0_i32, %c0_i32_0 : i32, i32
  }
  func.func @transform_5(%arg0: i32) -> (i32, i32) {
    %c0_i32 = arith.constant 0 : i32
    %c0_i32_0 = arith.constant 0 : i32
    %c0_i32_1 = arith.constant 0 : i32
    return %c0_i32, %c0_i32_0 : i32, i32
  }
  func.func @transform_6(%arg0: i32) -> (i32, i32) {
    %c0_i32 = arith.constant 0 : i32
    %c0_i32_0 = arith.constant 0 : i32
    %c0_i32_1 = arith.constant 0 : i32
    return %c0_i32, %c0_i32_0 : i32, i32
  }
  func.func @transform_7(%arg0: i32) -> (i32, i32) {
    %c0_i32 = arith.constant 0 : i32
    %c0_i32_0 = arith.constant 0 : i32
    %c0_i32_1 = arith.constant 0 : i32
    return %c0_i32, %c0_i32_0 : i32, i32
  }
  func.func @transform_8(%arg0: i32) -> (i32, i32) {
    %c0_i32 = arith.constant 0 : i32
    %c0_i32_0 = arith.constant 0 : i32
    %c0_i32_1 = arith.constant 0 : i32
    return %c0_i32, %c0_i32_0 : i32, i32
  }
  func.func @transform_9(%arg0: i32) -> (i32, i32) {
    %c0_i32 = arith.constant 0 : i32
    %c0_i32_0 = arith.constant 0 : i32
    %c0_i32_1 = arith.constant 0 : i32
    return %c0_i32, %c0_i32_0 : i32, i32
  }
  func.func @transform_10(%arg0: i32) -> (i32, i32) {
    %c0_i32 = arith.constant 0 : i32
    %c0_i32_0 = arith.constant 0 : i32
    %c0_i32_1 = arith.constant 0 : i32
    return %c0_i32, %c0_i32_0 : i32, i32
  }
  func.func @transform_11(%arg0: i32) -> (i32, i32) {
    %c0_i32 = arith.constant 0 : i32
    %c0_i32_0 = arith.constant 0 : i32
    %c0_i32_1 = arith.constant 0 : i32
    return %c0_i32, %c0_i32_0 : i32, i32
  }
  func.func @transform_12(%arg0: i32) -> (i32, i32) {
    %c0_i32 = arith.constant 0 : i32
    %c0_i32_0 = arith.constant 0 : i32
    return %arg0, %c0_i32 : i32, i32
  }
}

</mosaic_0001>

<bundles_post_ra>
// kernel: tpu_custom_call.1
= control target key start
LH: loop header
LB: loop body
LE: loop exit
PB: predicated region body
PF: predicated region fallthrough
CT: control target
= control target key end

     0   :  { %17 = vsyncpa [#allocation3], 0  ;;  %s2838_s0 = inlined_call_operand.vmem [shape: f32[8,16], index: 0, kind: input, shape index: {}]   ;;  %s2839_s1 = inlined_call_operand.vmem [shape: bf16[16,512], index: 1, kind: input, shape index: {}]   ;;  %s2840_s2 = inlined_call_operand.vmem [shape: f32[1,512], index: 2, kind: input, shape index: {}]   ;;  %s2841_s3 = inlined_call_operand.hbm [shape: bf16[512,256], index: 3, kind: input, shape index: {}]   ;;  %s2842_s4 = inlined_call_operand.vmem [shape: f32[1,256], index: 4, kind: input, shape index: {}]   ;;  %s2843_s5 = inlined_call_operand.hbm [shape: bf16[256,128], index: 5, kind: input, shape index: {}]   ;;  %s2844_s6 = inlined_call_operand.vmem [shape: f32[1,128], index: 6, kind: input, shape index: {}]   ;;  %s2845_s7 = inlined_call_operand.vmem [shape: bf16[128,512], index: 7, kind: input, shape index: {}]   ;;  %s2846_s8 = inlined_call_operand.vmem [shape: f32[1,512], index: 8, kind: input, shape index: {}]   ;;  %s2847_s9 = inlined_call_operand.vmem [shape: bf16[512,40], index: 9, kind: input, shape index: {}]   ;;  %s2848_s10 = inlined_call_operand.vmem [shape: f32[1,40], index: 10, kind: input, shape index: {}]   ;;  %s2849_s11 = inlined_call_operand.vmem [shape: f32[1,8], index: 11, kind: input, shape index: {}]   ;;  %s2850_s12 = inlined_call_operand.vmem [shape: f32[8,4], index: 12, kind: output, shape index: {}]  }
   0x1   :  { %s29_s23 = sshll.u32 %s2841_s3, 4  ;;  %s30_s23 = int_to_ptr.hbm [resolvable:$true] %s29_s23 }
   0x2   :  { %18 = vsyncpa [#allocation5], 0  ;;  %s2387_s24 = smov [#allocation2]   ;;  %s44_s28 = sshll.u32 %s2843_s5, 4  ;;  %s45_s28 = int_to_ptr.hbm [resolvable:$true] %s44_s28 }
   0x3   :  { %s31_s25 = sshll.u32 %s2387_s24, 4  ;;  %s2388_s29 = smov 128   ;;  %s32_s25 = int_to_ptr.vmem [resolvable:$true] %s31_s25 }
   0x4   :  { %s2389_s30 = smov 8   ;;  %s2390_s13 = smov [#allocation4]  }
   0x5   :  { %37 = dma.hbm_to_vmem [thread:$0]  %s30_s23, 8192, %s32_s25, [#allocation3], %s2388_s29, %s2388_s29, %s2389_s30  }
   0x6   :  { %s46_s14 = sshll.u32 %s2390_s13, 4  ;;  %s2391_s15 = smov 64   ;;  %s47_s14 = int_to_ptr.vmem [resolvable:$true] %s46_s14 }
   0x7   :  { %s2392_s16 = smov 4  }
   0x8   :  { %52 = dma.hbm_to_vmem [thread:$0]  %s45_s28, 2048, %s47_s14, [#allocation5], %s2391_s15, %s2391_s15, %s2392_s16  }
   0x9   :  { %2383 = dma.done.wait [#allocation3], 8192  }
   0xa   :  { %2384 = vsyncadd [#allocation3], 4294959104 }
   0xb   :  { %2385 = dma.done.wait [#allocation5], 2048  }
   0xc   :  { %2386 = vsyncadd [#allocation5], 4294965248  ;;  %v1561_v0 = vld [vmem:[%s2839_s1] sm:$0xf]  ;;  %v2157_v1 = vld [vmem:[%s2839_s1 + $0xc] sm:$0xf0] }
   0xd   :  { %v2155_v2 = vld [vmem:[%s2839_s1 + $0x4] sm:$0xf]  ;;  %v1562_v3 = vor.u32 %v2157_v1, %v1561_v0  ;;  %v1563_v4 = vld [vmem:[%s2839_s1 + $0x10] sm:$0xf0]  ;;  %vm110_vm0 = vcmask 130048   ;;  %s2394_s23 = smov 104  }
   0xe   :  { %v74_v5 = vld [vmem:[%s2838_s0] sm:$0xff]  ;;  %v1569_v6 = vld [vmem:[%s2839_s1 + $0x8] sm:$0xf]  ;;  %v1566_v7 = vor.u32 %v2155_v2, %v1563_v4  ;;  %v2158_v9 = vld [vmem:[%s2839_s1 + $0x14] sm:$0xf0]  ;;  %s2395_s24 = smov 120  }
   0xf   :  { %v2490_v8 = vpack.c.bf16 %v74_v5, %v74_v5  ;;  %v2156_v10 = vld [vmem:[%s2839_s1 + $0xc] sm:$0xf]  ;;  %v1571_v11 = vld [vmem:[%s2839_s1 + $0x18] sm:$0xf0]  ;;  %121 = vmatpush.bf16.msra.mxu2 %v1562_v3  ;;  %v1570_v12 = vor.u32 %v2158_v9, %v1569_v6  ;;  %v1637_v14 = vld [vmem:[#allocation2 + $0x70] sm:$0xf] }
  0x10   :  { %v1574_v13 = vor.u32 %v2156_v10, %v1571_v11  ;;  %v2174_v15 = vld [vmem:[#allocation2 + $0x74] sm:$0xf0]  ;;  %v1701_v16 = vld [vmem:[#allocation2 + $0xf0] sm:$0xf]  ;;  %134 = vmatpush.bf16.msra.mxu3 %v1566_v7  ;;  %v1629_v19 = vld [vmem:[#allocation2 + $0x60] sm:$0xf] }
  0x11   :  { %v1638_v17 = vor.u32 %v2174_v15, %v1637_v14  ;;  %v2190_v18 = vld [vmem:[#allocation2 + $0xf4] sm:$0xf0]  ;;  %v2172_v20 = vld [vmem:[#allocation2 + $0x64] sm:$0xf0]  ;;  %v1693_v22 = vld [vmem:[#allocation2 + $0xe0] sm:$0xf] }
  0x12   :  { %v1702_v21 = vor.u32 %v2190_v18, %v1701_v16  ;;  %v2188_v23 = vld [vmem:[#allocation2 + $0xe4] sm:$0xf0]  ;;  %1575 = vmatmul.msk.bf16.vlgmr.msra.gmra.mxu2 %vm110_vm0, %v2490_v8  ;;  %v1630_v24 = vor.u32 %v2172_v20, %v1629_v19  ;;  %v1621_v26 = vld [vmem:[#allocation2 + $0x50] sm:$0xf]  ;;  %v2170_v27 = vld [vmem:[#allocation2 + $0x54] sm:$0xf0] }
  0x13   :  { %147 = vmatpush.bf16.msrb.mxu2 %v1570_v12  ;;  %564 = vmatpush.bf16.msra.mxu0 %v1638_v17  ;;  %v1694_v25 = vor.u32 %v2188_v23, %v1693_v22  ;;  %v1685_v28 = vld [vmem:[#allocation2 + $0xd0] sm:$0xf]  ;;  %v2186_v29 = vld [vmem:[#allocation2 + $0xd4] sm:$0xf0]  ;;  %v1622_v31 = vor.u32 %v2170_v27, %v1621_v26  ;;  %v1613_v36 = vld [vmem:[#allocation2 + $0x40] sm:$0xf] }
  0x14   :  { %160 = vmatpush.bf16.msrb.mxu3 %v1574_v13  ;;  %577 = vmatpush.bf16.msra.mxu1 %v1702_v21  ;;  %v1765_v30 = vld [vmem:[#allocation2 + $0x170] sm:$0xf]  ;;  %v2206_v32 = vld [vmem:[#allocation2 + $0x174] sm:$0xf0]  ;;  %v1686_v35 = vor.u32 %v2186_v29, %v1685_v28  ;;  %v2168_v37 = vld [vmem:[#allocation2 + $0x44] sm:$0xf0] }
  0x15   :  { %1576 = vmatmul.msk.bf16.vlgmr.msra.gmra.mxu3 %vm110_vm0, %v2490_v8  ;;  %v1829_v33 = vld [vmem:[#allocation2 + $0x1f0] sm:$0xf]  ;;  %v2222_v34 = vld [vmem:[#allocation2 + $0x1f4] sm:$0xf0]  ;;  %v1677_v38 = vld [vmem:[#allocation2 + $0xc0] sm:$0xf]  ;;  %v1766_v39 = vor.u32 %v2206_v32, %v1765_v30  ;;  %v1614_v47 = vor.u32 %v2168_v37, %v1613_v36 }
  0x16   :  { %v1830_v40 = vor.u32 %v2222_v34, %v1829_v33  ;;  %v2184_v41 = vld [vmem:[#allocation2 + $0xc4] sm:$0xf0]  ;;  %v1757_v42 = vld [vmem:[#allocation2 + $0x160] sm:$0xf]  ;;  %v1605_v48 = vld [vmem:[#allocation2 + $0x30] sm:$0xf] }
  0x17   :  { %565 = vmatpush.bf16.msra.mxu0 %v1630_v24  ;;  %v2204_v43 = vld [vmem:[#allocation2 + $0x164] sm:$0xf0]  ;;  %590 = vmatpush.bf16.msra.mxu2 %v1766_v39  ;;  %v1821_v45 = vld [vmem:[#allocation2 + $0x1e0] sm:$0xf]  ;;  %v2166_v49 = vld [vmem:[#allocation2 + $0x34] sm:$0xf0]  ;;  %v1678_v51 = vor.u32 %v2184_v41, %v1677_v38 }
  0x18   :  { %578 = vmatpush.bf16.msra.mxu1 %v1694_v25  ;;  %603 = vmatpush.bf16.msra.mxu3 %v1830_v40  ;;  %v1758_v44 = vor.u32 %v2204_v43, %v1757_v42  ;;  %v2220_v46 = vld [vmem:[#allocation2 + $0x1e4] sm:$0xf0]  ;;  %v1749_v52 = vld [vmem:[#allocation2 + $0x150] sm:$0xf]  ;;  %v2202_v53 = vld [vmem:[#allocation2 + $0x154] sm:$0xf0]  ;;  %v1606_v61 = vor.u32 %v2166_v49, %v1605_v48 }
  0x19   :  { %v1822_v50 = vor.u32 %v2220_v46, %v1821_v45  ;;  %v1813_v54 = vld [vmem:[#allocation2 + $0x1d0] sm:$0xf]  ;;  %v2182_v56 = vld [vmem:[#allocation2 + $0xb4] sm:$0xf0]  ;;  %v1750_v58 = vor.u32 %v2202_v53, %v1749_v52  ;;  %v1741_v60 = vld [vmem:[#allocation2 + $0x140] sm:$0xf] }
  0x1a   :  { %v1669_v55 = vld [vmem:[#allocation2 + $0xb0] sm:$0xf]  ;;  %v2218_v57 = vld [vmem:[#allocation2 + $0x1d4] sm:$0xf0]  ;;  %v2200_v62 = vld [vmem:[#allocation2 + $0x144] sm:$0xf0] }
  0x1b   :  { %566 = vmatpush.bf16.msra.mxu0 %v1622_v31  ;;  %591 = vmatpush.bf16.msra.mxu2 %v1758_v44  ;;  %v1814_v59 = vor.u32 %v2218_v57, %v1813_v54  ;;  %v1805_v63 = vld [vmem:[#allocation2 + $0x1c0] sm:$0xf]  ;;  %v2216_v0 = vld [vmem:[#allocation2 + $0x1c4] sm:$0xf0]  ;;  %v1670_v1 = vor.u32 %v2182_v56, %v1669_v55  ;;  %v1742_v6 = vor.u32 %v2200_v62, %v1741_v60  ;;  %v1733_v9 = vld [vmem:[#allocation2 + $0x130] sm:$0xf] }
  0x1c   :  { %579 = vmatpush.bf16.msra.mxu1 %v1686_v35  ;;  %604 = vmatpush.bf16.msra.mxu3 %v1822_v50  ;;  %v1597_v2 = vld [vmem:[#allocation2 + $0x20] sm:$0xf]  ;;  %v2164_v3 = vld [vmem:[#allocation2 + $0x24] sm:$0xf0]  ;;  %v1806_v7 = vor.u32 %v2216_v0, %v1805_v63  ;;  %v2198_v11 = vld [vmem:[#allocation2 + $0x134] sm:$0xf0] }
  0x1d   :  { %v1661_v4 = vld [vmem:[#allocation2 + $0xa0] sm:$0xf]  ;;  %v2180_v5 = vld [vmem:[#allocation2 + $0xa4] sm:$0xf0]  ;;  %v1598_v10 = vor.u32 %v2164_v3, %v1597_v2  ;;  %v1797_v12 = vld [vmem:[#allocation2 + $0x1b0] sm:$0xf]  ;;  %v1734_v19 = vor.u32 %v2198_v11, %v1733_v9 }
  0x1e   :  { %v2214_v13 = vld [vmem:[#allocation2 + $0x1b4] sm:$0xf0]  ;;  %v1662_v14 = vor.u32 %v2180_v5, %v1661_v4  ;;  %v1589_v15 = vld [vmem:[#allocation2 + $0x10] sm:$0xf]  ;;  %v1725_v21 = vld [vmem:[#allocation2 + $0x120] sm:$0xf] }
  0x1f   :  { %567 = vmatpush.bf16.msra.mxu0 %v1614_v47  ;;  %592 = vmatpush.bf16.msra.mxu2 %v1750_v58  ;;  %v2162_v16 = vld [vmem:[#allocation2 + $0x14] sm:$0xf0]  ;;  %v1653_v17 = vld [vmem:[#allocation2 + $0x90] sm:$0xf]  ;;  %v1798_v20 = vor.u32 %v2214_v13, %v1797_v12  ;;  %v2196_v23 = vld [vmem:[#allocation2 + $0x124] sm:$0xf0] }
  0x20   :  { %580 = vmatpush.bf16.msra.mxu1 %v1678_v51  ;;  %605 = vmatpush.bf16.msra.mxu3 %v1814_v59  ;;  %v2178_v18 = vld [vmem:[#allocation2 + $0x94] sm:$0xf0]  ;;  %v1590_v22 = vor.u32 %v2162_v16, %v1589_v15  ;;  %v1789_v24 = vld [vmem:[#allocation2 + $0x1a0] sm:$0xf]  ;;  %v2212_v25 = vld [vmem:[#allocation2 + $0x1a4] sm:$0xf0]  ;;  %v1726_v34 = vor.u32 %v2196_v23, %v1725_v21 }
  0x21   :  { %v1654_v26 = vor.u32 %v2178_v18, %v1653_v17  ;;  %v1581_v27 = vld [vmem:[#allocation2] sm:$0xf]  ;;  %v2176_v29 = vld [vmem:[#allocation2 + $0x84] sm:$0xf0]  ;;  %v2173_v30 = vld [vmem:[#allocation2 + $0x74] sm:$0xf]  ;;  %v1790_v35 = vor.u32 %v2212_v25, %v1789_v24 }
  0x22   :  { %1577 = vmatmul.msk.bf16.vlgmr.msrb.gmra.mxu2 %vm110_vm0, %v2490_v8  ;;  %v1645_v28 = vld [vmem:[#allocation2 + $0x80] sm:$0xf]  ;;  %v1639_v31 = vld [vmem:[#allocation2 + $0x78] sm:$0xf0]  ;;  %v2189_v32 = vld [vmem:[#allocation2 + $0xf4] sm:$0xf] }
  0x23   :  { %568 = vmatpush.bf16.msra.mxu0 %v1606_v61  ;;  %593 = vmatpush.bf16.msra.mxu2 %v1742_v6  ;;  %v1703_v33 = vld [vmem:[#allocation2 + $0xf8] sm:$0xf0]  ;;  %v1646_v37 = vor.u32 %v2176_v29, %v1645_v28  ;;  %v1642_v38 = vor.u32 %v2173_v30, %v1639_v31  ;;  %v2171_v40 = vld [vmem:[#allocation2 + $0x64] sm:$0xf]  ;;  %v1631_v41 = vld [vmem:[#allocation2 + $0x68] sm:$0xf0] }
  0x24   :  { %581 = vmatpush.bf16.msra.mxu1 %v1670_v1  ;;  %606 = vmatpush.bf16.msra.mxu3 %v1806_v7  ;;  %v1706_v39 = vor.u32 %v2189_v32, %v1703_v33  ;;  %v2187_v42 = vld [vmem:[#allocation2 + $0xe4] sm:$0xf]  ;;  %v1695_v43 = vld [vmem:[#allocation2 + $0xe8] sm:$0xf0]  ;;  %v1634_v44 = vor.u32 %v2171_v40, %v1631_v41  ;;  %v2169_v46 = vld [vmem:[#allocation2 + $0x54] sm:$0xf] }
  0x25   :  { %1578 = vmatmul.msk.bf16.vlgmr.msrb.gmra.mxu3 %vm110_vm0, %v2490_v8  ;;  %v2160_v8 = vld [vmem:[#allocation2 + $0x4] sm:$0xf0]  ;;  %v1698_v45 = vor.u32 %v2187_v42, %v1695_v43  ;;  %v1623_v47 = vld [vmem:[#allocation2 + $0x58] sm:$0xf0]  ;;  %v2185_v48 = vld [vmem:[#allocation2 + $0xd4] sm:$0xf] }
  0x26   :  { %v1582_v36 = vor.u32 %v2160_v8, %v1581_v27  ;;  %v1626_v49 = vor.u32 %v2169_v46, %v1623_v47  ;;  %v1687_v50 = vld [vmem:[#allocation2 + $0xd8] sm:$0xf0]  ;;  %v1717_v52 = vld [vmem:[#allocation2 + $0x110] sm:$0xf]  ;;  %v2194_v53 = vld [vmem:[#allocation2 + $0x114] sm:$0xf0] }
  0x27   :  { %569 = vmatpush.bf16.msra.mxu0 %v1598_v10  ;;  %594 = vmatpush.bf16.msra.mxu2 %v1734_v19  ;;  %v1690_v51 = vor.u32 %v2185_v48, %v1687_v50  ;;  %v1781_v54 = vld [vmem:[#allocation2 + $0x190] sm:$0xf]  ;;  %v1718_v55 = vor.u32 %v2194_v53, %v1717_v52  ;;  %v2210_v56 = vld [vmem:[#allocation2 + $0x194] sm:$0xf0]  ;;  %v2167_v57 = vld [vmem:[#allocation2 + $0x44] sm:$0xf] }
  0x28   :  { %582 = vmatpush.bf16.msra.mxu1 %v1662_v14  ;;  %607 = vmatpush.bf16.msra.mxu3 %v1798_v20  ;;  %v1615_v58 = vld [vmem:[#allocation2 + $0x48] sm:$0xf0]  ;;  %v1782_v59 = vor.u32 %v2210_v56, %v1781_v54  ;;  %v2183_v61 = vld [vmem:[#allocation2 + $0xc4] sm:$0xf]  ;;  %v1709_v0 = vld [vmem:[#allocation2 + $0x100] sm:$0xf] }
  0x29   :  { %v1618_v60 = vor.u32 %v2167_v57, %v1615_v58  ;;  %v1679_v62 = vld [vmem:[#allocation2 + $0xc8] sm:$0xf0]  ;;  %v2192_v1 = vld [vmem:[#allocation2 + $0x104] sm:$0xf0]  ;;  %v1773_v2 = vld [vmem:[#allocation2 + $0x180] sm:$0xf] }
  0x2a   :  { %v1682_v63 = vor.u32 %v2183_v61, %v1679_v62  ;;  %v1710_v3 = vor.u32 %v2192_v1, %v1709_v0  ;;  %v2208_v4 = vld [vmem:[#allocation2 + $0x184] sm:$0xf0]  ;;  %v2165_v5 = vld [vmem:[#allocation2 + $0x34] sm:$0xf]  ;;  %v1607_v6 = vld [vmem:[#allocation2 + $0x38] sm:$0xf0] }
  0x2b   :  { %570 = vmatpush.bf16.msra.mxu0 %v1590_v22  ;;  %595 = vmatpush.bf16.msra.mxu2 %v1726_v34  ;;  %v1774_v7 = vor.u32 %v2208_v4, %v1773_v2  ;;  %v1610_v9 = vor.u32 %v2165_v5, %v1607_v6  ;;  %v2181_v10 = vld [vmem:[#allocation2 + $0xb4] sm:$0xf]  ;;  %v1671_v11 = vld [vmem:[#allocation2 + $0xb8] sm:$0xf0]  ;;  %v2163_v19 = vld [vmem:[#allocation2 + $0x24] sm:$0xf] }
  0x2c   :  { %583 = vmatpush.bf16.msra.mxu1 %v1654_v26  ;;  %608 = vmatpush.bf16.msra.mxu3 %v1790_v35  ;;  %v2205_v12 = vld [vmem:[#allocation2 + $0x174] sm:$0xf]  ;;  %v1674_v13 = vor.u32 %v2181_v10, %v1671_v11  ;;  %v1767_v14 = vld [vmem:[#allocation2 + $0x178] sm:$0xf0]  ;;  %v1599_v20 = vld [vmem:[#allocation2 + $0x28] sm:$0xf0] }
  0x2d   :  { %v2221_v15 = vld [vmem:[#allocation2 + $0x1f4] sm:$0xf]  ;;  %v1831_v16 = vld [vmem:[#allocation2 + $0x1f8] sm:$0xf0]  ;;  %v1770_v17 = vor.u32 %v2205_v12, %v1767_v14  ;;  %v2179_v21 = vld [vmem:[#allocation2 + $0xa4] sm:$0xf]  ;;  %v1602_v22 = vor.u32 %v2163_v19, %v1599_v20 }
  0x2e   :  { %v1834_v18 = vor.u32 %v2221_v15, %v1831_v16  ;;  %v1663_v23 = vld [vmem:[#allocation2 + $0xa8] sm:$0xf0]  ;;  %v2203_v24 = vld [vmem:[#allocation2 + $0x164] sm:$0xf]  ;;  %v2161_v30 = vld [vmem:[#allocation2 + $0x14] sm:$0xf] }
  0x2f   :  { %571 = vmatpush.bf16.msra.mxu0 %v1582_v36  ;;  %596 = vmatpush.bf16.msra.mxu2 %v1718_v55  ;;  %v1759_v25 = vld [vmem:[#allocation2 + $0x168] sm:$0xf0]  ;;  %v1666_v26 = vor.u32 %v2179_v21, %v1663_v23  ;;  %v2219_v8 = vld [vmem:[#allocation2 + $0x1e4] sm:$0xf]  ;;  %v1591_v31 = vld [vmem:[#allocation2 + $0x18] sm:$0xf0] }
  0x30   :  { %584 = vmatpush.bf16.msra.mxu1 %v1646_v37  ;;  %609 = vmatpush.bf16.msra.mxu3 %v1782_v59  ;;  %v1762_v27 = vor.u32 %v2203_v24, %v1759_v25  ;;  %v1823_v28 = vld [vmem:[#allocation2 + $0x1e8] sm:$0xf0]  ;;  %v2177_v32 = vld [vmem:[#allocation2 + $0x94] sm:$0xf]  ;;  %v1594_v33 = vor.u32 %v2161_v30, %v1591_v31  ;;  %v1655_v34 = vld [vmem:[#allocation2 + $0x98] sm:$0xf0] }
  0x31   :  { %v1826_v29 = vor.u32 %v2219_v8, %v1823_v28  ;;  %v2201_v35 = vld [vmem:[#allocation2 + $0x154] sm:$0xf]  ;;  %v1751_v36 = vld [vmem:[#allocation2 + $0x158] sm:$0xf0]  ;;  %v1658_v37 = vor.u32 %v2177_v32, %v1655_v34  ;;  %v2159_v42 = vld [vmem:[#allocation2 + $0x4] sm:$0xf] }
  0x32   :  { %v1815_v40 = vld [vmem:[#allocation2 + $0x1d8] sm:$0xf0]  ;;  %v1583_v43 = vld [vmem:[#allocation2 + $0x8] sm:$0xf0]  ;;  %v2199_v47 = vld [vmem:[#allocation2 + $0x144] sm:$0xf] }
  0x33   :  { %616 = vmatpush.bf16.msrb.mxu0 %v1642_v38  ;;  %597 = vmatpush.bf16.msra.mxu2 %v1710_v3  ;;  %v1754_v38 = vor.u32 %v2201_v35, %v1751_v36  ;;  %v1647_v46 = vld [vmem:[#allocation2 + $0x88] sm:$0xf0]  ;;  %v2197_v54 = vld [vmem:[#allocation2 + $0x134] sm:$0xf]  ;;  %v1735_v55 = vld [vmem:[#allocation2 + $0x138] sm:$0xf0] }
  0x34   :  { %629 = vmatpush.bf16.msrb.mxu1 %v1706_v39  ;;  %610 = vmatpush.bf16.msra.mxu3 %v1774_v7  ;;  %v2217_v39 = vld [vmem:[#allocation2 + $0x1d4] sm:$0xf]  ;;  %v1743_v48 = vld [vmem:[#allocation2 + $0x148] sm:$0xf0]  ;;  %v1738_v57 = vor.u32 %v2197_v54, %v1735_v55  ;;  %v1799_v58 = vld [vmem:[#allocation2 + $0x1b8] sm:$0xf0] }
  0x35   :  { %v1818_v41 = vor.u32 %v2217_v39, %v1815_v40  ;;  %v1746_v50 = vor.u32 %v2199_v47, %v1743_v48  ;;  %v1807_v52 = vld [vmem:[#allocation2 + $0x1c8] sm:$0xf0]  ;;  %v2213_v56 = vld [vmem:[#allocation2 + $0x1b4] sm:$0xf]  ;;  %v2211_v62 = vld [vmem:[#allocation2 + $0x1a4] sm:$0xf] }
  0x36   :  { %v1802_v59 = vor.u32 %v2213_v56, %v1799_v58  ;;  %v1727_v61 = vld [vmem:[#allocation2 + $0x128] sm:$0xf0]  ;;  %v2193_v3 = vld [vmem:[#allocation2 + $0x114] sm:$0xf]  ;;  %v1719_v4 = vld [vmem:[#allocation2 + $0x118] sm:$0xf0] }
  0x37   :  { %617 = vmatpush.bf16.msrb.mxu0 %v1634_v44  ;;  %642 = vmatpush.bf16.msrb.mxu2 %v1770_v17  ;;  %v2175_v44 = vld [vmem:[#allocation2 + $0x84] sm:$0xf]  ;;  %v1791_v0 = vld [vmem:[#allocation2 + $0x1a8] sm:$0xf0]  ;;  %v2209_v5 = vld [vmem:[#allocation2 + $0x194] sm:$0xf]  ;;  %v1722_v10 = vor.u32 %v2193_v3, %v1719_v4 }
  0x38   :  { %630 = vmatpush.bf16.msrb.mxu1 %v1698_v45  ;;  %655 = vmatpush.bf16.msrb.mxu3 %v1834_v18  ;;  %v1586_v45 = vor.u32 %v2159_v42, %v1583_v43  ;;  %v1794_v2 = vor.u32 %v2211_v62, %v1791_v0  ;;  %v1783_v6 = vld [vmem:[#allocation2 + $0x198] sm:$0xf0]  ;;  %v1711_v14 = vld [vmem:[#allocation2 + $0x108] sm:$0xf0]  ;;  %v2207_v17 = vld [vmem:[#allocation2 + $0x184] sm:$0xf] }
  0x39   :  { %v1786_v11 = vor.u32 %v2209_v5, %v1783_v6  ;;  %v1775_v18 = vld [vmem:[#allocation2 + $0x188] sm:$0xf0]  ;;  %v2230_v39 = vld [vmem:[#allocation4 + $0x38] sm:$0xff]  ;;  %v2229_v40 = vld [vmem:[#allocation4 + $0x30] sm:$0xff]  ;;  %s2396_s25 = smov 24   ;;  %s2397_s26 = smov 112  }
  0x3a   :  { %v1778_v23 = vor.u32 %v2207_v17, %v1775_v18  ;;  %v2227_v42 = vld [vmem:[#allocation4 + $0x20] sm:$0xff]  ;;  %v2226_v43 = vld [vmem:[#allocation4 + $0x18] sm:$0xff]  ;;  %v2224_v47 = vld [vmem:[#allocation4 + $0x8] sm:$0xff]  ;;  %vm1430_vm1 = vcmask 326912   ;;  %vm1441_vm2 = vcmask 64512   ;;  %vm1545_vm3 = vcmask 7168  }
  0x3b   :  { %618 = vmatpush.bf16.msrb.mxu0 %v1626_v49  ;;  %643 = vmatpush.bf16.msrb.mxu2 %v1762_v27  ;;  %v1650_v49 = vor.u32 %v2175_v44, %v1647_v46  ;;  %v2238_v44 = vld [vmem:[#allocation4 + $0x78] sm:$0xff]  ;;  %v2237_v46 = vld [vmem:[#allocation4 + $0x70] sm:$0xff]  ;;  %v2236_v48 = vld [vmem:[#allocation4 + $0x68] sm:$0xff]  ;;  %vm1547_vm4 = vcmask 15360   ;;  %vm1549_vm5 = vcmask 23552   ;;  %vm1551_vm6 = vcmask 31744  }
  0x3c   :  { %631 = vmatpush.bf16.msrb.mxu1 %v1690_v51  ;;  %656 = vmatpush.bf16.msrb.mxu3 %v1826_v29  ;;  %v2215_v51 = vld [vmem:[#allocation2 + $0x1c4] sm:$0xf]  ;;  %v2233_v54 = vld [vmem:[#allocation4 + $0x50] sm:$0xff]  ;;  %v2232_v55 = vld [vmem:[#allocation4 + $0x48] sm:$0xff] }
  0x3d   :  { %v1810_v53 = vor.u32 %v2215_v51, %v1807_v52  ;;  %v2234_v51 = vld [vmem:[#allocation4 + $0x58] sm:$0xff]  ;;  %v238_v58 = vld [vmem:[%s2842_s4] sm:$0x3]  ;;  %v2269_v62 = vld [vmem:[%s2845_s7 + $0xec] sm:$0xf0]  ;;  %s2393_s4 = smov 32  }
  0x3e   :  { %v2021_v3 = vld [vmem:[%s2845_s7 + $0xe8] sm:$0xf]  ;;  %v2270_v4 = vld [vmem:[%s2845_s7 + $0xf4] sm:$0xf0] }
  0x3f   :  { %619 = vmatpush.bf16.msrb.mxu0 %v1618_v60  ;;  %644 = vmatpush.bf16.msrb.mxu2 %v1754_v38  ;;  %v2195_v60 = vld [vmem:[#allocation2 + $0x124] sm:$0xf] }
  0x40   :  { %632 = vmatpush.bf16.msrb.mxu1 %v1682_v63  ;;  %657 = vmatpush.bf16.msrb.mxu3 %v1818_v41  ;;  %v80_v63 = vld [vmem:[%s2840_s2] sm:$0xf]  ;;  %v1730_v1 = vor.u32 %v2195_v60, %v1727_v61  ;;  %v2228_v41 = vld [vmem:[#allocation4 + $0x28] sm:$0xff]  ;;  %v240_v60 = vperm.slane %v238_v58, 0 }
  0x41   :  { %v82_v7 = vperm.slane %v80_v63, 0  ;;  %v84_v8 = vperm.slane %v80_v63, 2  ;;  %v85_v28 = vperm.slane %v80_v63, 3  ;;  %v2013_v61 = vld [vmem:[%s2845_s7 + $0xe0] sm:$0xf] }
  0x43   :  { %620 = vmatpush.bf16.msrb.mxu0 %v1610_v9  ;;  %645 = vmatpush.bf16.msrb.mxu2 %v1746_v50  ;;  %v83_v9 = vperm.slane %v80_v63, 1  ;;  %v2235_v50 = vld [vmem:[#allocation4 + $0x60] sm:$0xff] }
  0x44   :  { %633 = vmatpush.bf16.msrb.mxu1 %v1674_v13  ;;  %658 = vmatpush.bf16.msrb.mxu3 %v1810_v53  ;;  %v2191_v13 = vld [vmem:[#allocation2 + $0x104] sm:$0xf] }
  0x45   :  { %v1714_v21 = vor.u32 %v2191_v13, %v1711_v14  ;;  %v2267_v63 = vld [vmem:[%s2845_s7 + $0xe4] sm:$0xf]  ;;  %v2265_v14 = vld [vmem:[%s2845_s7 + $0xcc] sm:$0xf0] }
  0x47   :  { %621 = vmatpush.bf16.msrb.mxu0 %v1602_v22  ;;  %646 = vmatpush.bf16.msrb.mxu2 %v1738_v57 }
  0x48   :  { %634 = vmatpush.bf16.msrb.mxu1 %v1666_v26  ;;  %659 = vmatpush.bf16.msrb.mxu3 %v1802_v59  ;;  %v2231_v59 = vld [vmem:[#allocation4 + $0x40] sm:$0xff] }
  0x4b   :  { %622 = vmatpush.bf16.msrb.mxu0 %v1594_v33  ;;  %647 = vmatpush.bf16.msrb.mxu2 %v1730_v1  ;;  %v2014_v1 = vor.u32 %v2269_v62, %v2013_v61  ;;  %v1967_v62 = vld [vmem:[%s2845_s7 + $0x90] sm:$0xf0] }
  0x4c   :  { %635 = vmatpush.bf16.msrb.mxu1 %v1658_v37  ;;  %660 = vmatpush.bf16.msrb.mxu3 %v1794_v2  ;;  %v2015_v2 = vld [vmem:[%s2845_s7 + $0xf0] sm:$0xf0] }
  0x4f   :  { %623 = vmatpush.bf16.msrb.mxu0 %v1586_v45  ;;  %648 = vmatpush.bf16.msrb.mxu2 %v1722_v10  ;;  %v2225_v45 = vld [vmem:[#allocation4 + $0x10] sm:$0xff]  ;;  %v2268_v10 = vld [vmem:[%s2845_s7 + $0xec] sm:$0xf] }
  0x50   :  { %636 = vmatpush.bf16.msrb.mxu1 %v1650_v49  ;;  %661 = vmatpush.bf16.msrb.mxu3 %v1786_v11  ;;  %v2223_v49 = vld [vmem:[#allocation4] sm:$0xff]  ;;  %v2023_v11 = vld [vmem:[%s2845_s7 + $0xf8] sm:$0xf0] }
  0x51   :  { %v2026_v13 = vor.u32 %v2268_v10, %v2023_v11  ;;  %v1951_v11 = vld [vmem:[%s2845_s7 + $0x70] sm:$0xf0] }
  0x53   :  { %649 = vmatpush.bf16.msrb.mxu2 %v1714_v21  ;;  %v2264_v21 = vld [vmem:[%s2845_s7 + $0xcc] sm:$0xf] }
  0x54   :  { %662 = vmatpush.bf16.msrb.mxu3 %v1778_v23  ;;  %v2007_v23 = vld [vmem:[%s2845_s7 + $0xd8] sm:$0xf0] }
  0x95   :  { %v123_v12 = vpop.f32.mrf.mxu2 }
  0x96   :  { %v124_v15 = vadd.f32 %v123_v12, %v82_v7  ;;  %v2018_v7 = vor.u32 %v2267_v63, %v2015_v2  ;;  %v1997_v12 = vld [vmem:[%s2845_s7 + $0xc0] sm:$0xf]  ;;  %v1973_v63 = vld [vmem:[%s2845_s7 + $0x88] sm:$0xf] }
  0x97   :  { %v1998_v17 = vor.u32 %v2265_v14, %v1997_v12  ;;  %v1957_v12 = vld [vmem:[%s2845_s7 + $0x68] sm:$0xf] }
  0x98   :  { %v136_v16 = vpop.f32.mrf.mxu3  ;;  %v166_v20 = vmax.f32 %v124_v15, 0.0  ;;  %v2263_v15 = vld [vmem:[%s2845_s7 + $0xc4] sm:$0xf] }
  0x99   :  { %v137_v19 = vadd.f32 %v136_v16, %v83_v9  ;;  %v2022_v9 = vor.u32 %v2270_v4, %v2021_v3  ;;  %v1999_v16 = vld [vmem:[%s2845_s7 + $0xd0] sm:$0xf0]  ;;  %v2256_v3 = vld [vmem:[%s2845_s7 + $0x8c] sm:$0xf]  ;;  %v1975_v4 = vld [vmem:[%s2845_s7 + $0x98] sm:$0xf0] }
  0x9a   :  { %v170_v24 = vpack.c.bf16 %v166_v20, %v166_v20  ;;  %v2002_v18 = vor.u32 %v2263_v15, %v1999_v16  ;;  %v2266_v20 = vld [vmem:[%s2845_s7 + $0xd4] sm:$0xf0]  ;;  %v2252_v16 = vld [vmem:[%s2845_s7 + $0x6c] sm:$0xf] }
  0x9b   :  { %v167_v22 = vmax.f32 %v137_v19, 0.0  ;;  %v2005_v19 = vld [vmem:[%s2845_s7 + $0xc8] sm:$0xf] }
  0x9c   :  { %572 = vmatmul.bf16.vlgmr.msra.gmra.mxu0 %v170_v24 }
  0x9d   :  { %v171_v25 = vpack.c.bf16 %v167_v22, %v167_v22  ;;  %v125_v26 = vpop.f32.mrf.mxu2  ;;  %804 = vmatpush.bf16.msra.mxu0 %v2230_v39  ;;  %v2006_v22 = vor.u32 %v2266_v20, %v2005_v19  ;;  %v2249_v20 = vld [vmem:[%s2845_s7 + $0x4c] sm:$0xf0] }
  0x9f   :  { %585 = vmatmul.bf16.vlgmr.msra.gmra.mxu1 %v171_v25 }
  0xa0   :  { %v138_v27 = vpop.f32.mrf.mxu3  ;;  %817 = vmatpush.bf16.msra.mxu1 %v2238_v44 }
  0xa1   :  { %805 = vmatpush.bf16.msra.mxu0 %v2229_v40 }
  0xa4   :  { %818 = vmatpush.bf16.msra.mxu1 %v2237_v46  ;;  %v1981_v46 = vld [vmem:[%s2845_s7 + $0xa0] sm:$0xf] }
  0xa5   :  { %v149_v29 = vpop.f32.mrf.mxu2  ;;  %806 = vmatpush.bf16.msra.mxu0 %v2228_v41 }
  0xa6   :  { %v150_v30 = vadd.f32 %v149_v29, %v84_v8 }
  0xa8   :  { %v162_v31 = vpop.f32.mrf.mxu3  ;;  %v168_v33 = vmax.f32 %v150_v30, 0.0  ;;  %819 = vmatpush.bf16.msra.mxu1 %v2236_v48  ;;  %v2259_v48 = vld [vmem:[%s2845_s7 + $0xa4] sm:$0xf] }
  0xa9   :  { %v163_v32 = vadd.f32 %v162_v31, %v85_v28  ;;  %807 = vmatpush.bf16.msra.mxu0 %v2227_v42 }
  0xaa   :  { %v172_v35 = vpack.c.bf16 %v168_v33, %v168_v33 }
  0xab   :  { %v169_v34 = vmax.f32 %v163_v32, 0.0  ;;  %v241_v32 = vperm.slane %v238_v58, 1  ;;  %v1965_v58 = vld [vmem:[%s2845_s7 + $0x80] sm:$0xf] }
  0xac   :  { %598 = vmatmul.bf16.vlgmr.msra.gmra.mxu2 %v172_v35  ;;  %624 = vmatmul.bf16.vlgmr.msrb.gmra.mxu0 %v170_v24 }
  0xad   :  { %v173_v36 = vpack.c.bf16 %v169_v34, %v169_v34  ;;  %v151_v37 = vpop.f32.mrf.mxu2  ;;  %808 = vmatpush.bf16.msra.mxu0 %v2226_v43  ;;  %820 = vmatpush.bf16.msra.mxu1 %v2235_v50  ;;  %v1983_v50 = vld [vmem:[%s2845_s7 + $0xb0] sm:$0xf0] }
  0xae   :  { %1034 = vmatpush.bf16.msra.mxu2 %v2014_v1 }
  0xaf   :  { %611 = vmatmul.bf16.vlgmr.msra.gmra.mxu3 %v173_v36  ;;  %637 = vmatmul.bf16.vlgmr.msrb.gmra.mxu1 %v171_v25  ;;  %v2010_v25 = vor.u32 %v2264_v21, %v2007_v23  ;;  %v2247_v21 = vld [vmem:[%s2845_s7 + $0x44] sm:$0xf] }
  0xb0   :  { %v164_v38 = vpop.f32.mrf.mxu3  ;;  %1047 = vmatpush.bf16.msra.mxu3 %v2018_v7  ;;  %v2253_v7 = vld [vmem:[%s2845_s7 + $0x6c] sm:$0xf0] }
  0xb1   :  { %809 = vmatpush.bf16.msra.mxu0 %v2225_v45  ;;  %821 = vmatpush.bf16.msra.mxu1 %v2234_v51  ;;  %v1989_v51 = vld [vmem:[%s2845_s7 + $0xa8] sm:$0xf] }
  0xb2   :  { %1035 = vmatpush.bf16.msra.mxu2 %v1998_v17  ;;  %v1959_v17 = vld [vmem:[%s2845_s7 + $0x78] sm:$0xf0] }
  0xb3   :  { %v1962_v19 = vor.u32 %v2252_v16, %v1959_v17 }
  0xb4   :  { %1048 = vmatpush.bf16.msra.mxu3 %v2002_v18  ;;  %v1933_v18 = vld [vmem:[%s2845_s7 + $0x40] sm:$0xf] }
  0xb5   :  { %810 = vmatpush.bf16.msra.mxu0 %v2224_v47  ;;  %822 = vmatpush.bf16.msra.mxu1 %v2233_v54  ;;  %v2261_v47 = vld [vmem:[%s2845_s7 + $0xac] sm:$0xf0]  ;;  %v1934_v23 = vor.u32 %v2249_v20, %v1933_v18 }
  0xb9   :  { %811 = vmatpush.bf16.msra.mxu0 %v2223_v49  ;;  %823 = vmatpush.bf16.msra.mxu1 %v2232_v55  ;;  %v1982_v49 = vor.u32 %v2261_v47, %v1981_v46  ;;  %v2260_v55 = vld [vmem:[%s2845_s7 + $0xac] sm:$0xf]  ;;  %v1903_v46 = vld [vmem:[%s2845_s7 + $0x10] sm:$0xf0]  ;;  %v1909_v47 = vld [vmem:[%s2845_s7 + $0x8] sm:$0xf] }
  0xbb   :  { %1036 = vmatpush.bf16.msra.mxu2 %v1982_v49 }
  0xbc   :  { %650 = vmatmul.bf16.vlgmr.msrb.gmra.mxu2 %v172_v35 }
  0xbd   :  { %824 = vmatpush.bf16.msra.mxu1 %v2231_v59  ;;  %1060 = vmatpush.bf16.msrb.mxu0 %v2022_v9  ;;  %v2257_v59 = vld [vmem:[%s2845_s7 + $0x8c] sm:$0xf0]  ;;  %v2251_v9 = vld [vmem:[%s2845_s7 + $0x64] sm:$0xf] }
  0xbe   :  { %v1966_v61 = vor.u32 %v2257_v59, %v1965_v58  ;;  %v1954_v14 = vor.u32 %v2251_v9, %v1951_v11  ;;  %v2293_v58 = vld [vmem:[%s2847_s9 + $0xb0] sm:$0xff]  ;;  %v2298_v9 = vld [vmem:[%s2847_s9 + $0xd8] sm:$0xff] }
  0xbf   :  { %663 = vmatmul.bf16.vlgmr.msrb.gmra.mxu3 %v173_v36  ;;  %v2301_v59 = vld [vmem:[%s2847_s9 + $0xf0] sm:$0xff]  ;;  %v2282_v11 = vld [vmem:[%s2847_s9 + $0x58] sm:$0xff] }
  0xc0   :  { %1037 = vmatpush.bf16.msra.mxu2 %v1966_v61  ;;  %v2285_v61 = vld [vmem:[%s2847_s9 + $0x70] sm:$0xff] }
  0xc1   :  { %1073 = vmatpush.bf16.msrb.mxu1 %v2026_v13  ;;  %1061 = vmatpush.bf16.msrb.mxu0 %v2006_v22  ;;  %v2254_v13 = vld [vmem:[%s2845_s7 + $0x74] sm:$0xf0]  ;;  %v1935_v22 = vld [vmem:[%s2845_s7 + $0x50] sm:$0xf0] }
  0xc2   :  { %v1958_v15 = vor.u32 %v2254_v13, %v1957_v12  ;;  %v2289_v13 = vld [vmem:[%s2847_s9 + $0x90] sm:$0xff] }
  0xc5   :  { %1074 = vmatpush.bf16.msrb.mxu1 %v2010_v25  ;;  %v1941_v25 = vld [vmem:[%s2845_s7 + $0x48] sm:$0xf] }
 0x119   :  { %v573_v52 = vpop.f32.mrf.mxu0 }
 0x11a   :  { %v574_v5 = vadd.f32 %v573_v52, %v240_v60  ;;  %v2262_v52 = vld [vmem:[%s2845_s7 + $0xb4] sm:$0xf0]  ;;  %v2255_v60 = vld [vmem:[%s2845_s7 + $0x84] sm:$0xf] }
 0x11b   :  { %v1990_v54 = vor.u32 %v2262_v52, %v1989_v51  ;;  %v1970_v1 = vor.u32 %v2255_v60, %v1967_v62  ;;  %v2240_v51 = vld [vmem:[%s2845_s7 + $0xc] sm:$0xf]  ;;  %v1911_v52 = vld [vmem:[%s2845_s7 + $0x18] sm:$0xf0]  ;;  %v2277_v60 = vld [vmem:[%s2847_s9 + $0x30] sm:$0xff] }
 0x11c   :  { %v586_v53 = vpop.f32.mrf.mxu1  ;;  %v2292_v62 = vld [vmem:[%s2847_s9 + $0xa8] sm:$0xff] }
 0x11d   :  { %v587_v24 = vadd.f32 %v586_v53, %v574_v5  ;;  %v1986_v53 = vor.u32 %v2259_v48, %v1983_v50  ;;  %1062 = vmatpush.bf16.msrb.mxu0 %v1990_v54  ;;  %v1978_v5 = vor.u32 %v2256_v3, %v1975_v4  ;;  %v2242_v48 = vld [vmem:[%s2845_s7 + $0x14] sm:$0xf0]  ;;  %v2291_v3 = vld [vmem:[%s2847_s9 + $0xa0] sm:$0xff] }
 0x11e   :  { %v1910_v50 = vor.u32 %v2242_v48, %v1909_v47  ;;  %v2294_v54 = vld [vmem:[%s2847_s9 + $0xb8] sm:$0xff]  ;;  %v2299_v4 = vld [vmem:[%s2847_s9 + $0xe0] sm:$0xff] }
 0x11f   :  { %1049 = vmatpush.bf16.msra.mxu3 %v1986_v53  ;;  %v1914_v53 = vor.u32 %v2240_v51, %v1911_v52 }
 0x121   :  { %v575_v56 = vpop.f32.mrf.mxu0 }
 0x122   :  { %v1991_v56 = vld [vmem:[%s2845_s7 + $0xb8] sm:$0xf0] }
 0x123   :  { %1050 = vmatpush.bf16.msra.mxu3 %v1970_v1  ;;  %v2284_v1 = vld [vmem:[%s2847_s9 + $0x68] sm:$0xff] }
 0x124   :  { %v588_v57 = vpop.f32.mrf.mxu1 }
 0x125   :  { %v1994_v57 = vor.u32 %v2260_v55, %v1991_v56  ;;  %v2302_v55 = vld [vmem:[%s2847_s9 + $0xf8] sm:$0xff] }
 0x126   :  { %v2278_v56 = vld [vmem:[%s2847_s9 + $0x38] sm:$0xff] }
 0x127   :  { %1075 = vmatpush.bf16.msrb.mxu1 %v1994_v57  ;;  %1051 = vmatpush.bf16.msra.mxu3 %v1954_v14  ;;  %v2286_v57 = vld [vmem:[%s2847_s9 + $0x78] sm:$0xff]  ;;  %v2297_v14 = vld [vmem:[%s2847_s9 + $0xd0] sm:$0xff] }
 0x129   :  { %v625_v0 = vpop.f32.mrf.mxu0 }
 0x12a   :  { %v626_v36 = vadd.f32 %v625_v0, %v241_v32  ;;  %v2258_v0 = vld [vmem:[%s2845_s7 + $0x94] sm:$0xf0]  ;;  %v2243_v32 = vld [vmem:[%s2845_s7 + $0x24] sm:$0xf] }
 0x12b   :  { %v1974_v2 = vor.u32 %v2258_v0, %v1973_v63  ;;  %1076 = vmatpush.bf16.msrb.mxu1 %v1978_v5  ;;  %v2300_v63 = vld [vmem:[%s2847_s9 + $0xe8] sm:$0xff]  ;;  %v2275_v5 = vld [vmem:[%s2847_s9 + $0x20] sm:$0xff] }
 0x12c   :  { %v638_v6 = vpop.f32.mrf.mxu1  ;;  %v2276_v0 = vld [vmem:[%s2847_s9 + $0x28] sm:$0xff] }
 0x12d   :  { %v639_v37 = vadd.f32 %v638_v6, %v626_v36  ;;  %1063 = vmatpush.bf16.msrb.mxu0 %v1974_v2  ;;  %v1949_v6 = vld [vmem:[%s2845_s7 + $0x60] sm:$0xf]  ;;  %v2246_v36 = vld [vmem:[%s2845_s7 + $0x34] sm:$0xf0] }
 0x12e   :  { %v1950_v10 = vor.u32 %v2253_v7, %v1949_v6  ;;  %v2283_v6 = vld [vmem:[%s2847_s9 + $0x60] sm:$0xff]  ;;  %v2290_v7 = vld [vmem:[%s2847_s9 + $0x98] sm:$0xff] }
 0x12f   :  { %v599_v26 = vpop.f32.mrf.mxu2  ;;  %1077 = vmatpush.bf16.msrb.mxu1 %v1962_v19 }
 0x130   :  { %v600_v27 = vadd.f32 %v599_v26, %v587_v24  ;;  %1038 = vmatpush.bf16.msra.mxu2 %v1950_v10  ;;  %v1938_v24 = vor.u32 %v2247_v21, %v1935_v22  ;;  %v2250_v26 = vld [vmem:[%s2845_s7 + $0x54] sm:$0xf0]  ;;  %v2288_v22 = vld [vmem:[%s2847_s9 + $0x88] sm:$0xff] }
 0x131   :  { %v627_v28 = vpop.f32.mrf.mxu0  ;;  %1064 = vmatpush.bf16.msrb.mxu0 %v1958_v15  ;;  %v2274_v10 = vld [vmem:[%s2847_s9 + $0x18] sm:$0xff]  ;;  %v2316_v15 = vld [vmem:[%s2844_s6] ss:$0 sm:$0xff] }
 0x132   :  { %v612_v8 = vpop.f32.mrf.mxu3  ;;  %v1943_v28 = vld [vmem:[%s2845_s7 + $0x58] sm:$0xf0]  ;;  %1052 = vmatpush.bf16.msra.mxu3 %v1938_v24  ;;  %v2273_v24 = vld [vmem:[%s2847_s9 + $0x10] sm:$0xff] }
 0x133   :  { %v613_v29 = vadd.f32 %v612_v8, %v600_v27  ;;  %v2248_v27 = vld [vmem:[%s2845_s7 + $0x4c] sm:$0xf]  ;;  %v1942_v8 = vor.u32 %v2250_v26, %v1941_v25  ;;  %v2281_v25 = vld [vmem:[%s2847_s9 + $0x50] sm:$0xff]  ;;  %v2287_v26 = vld [vmem:[%s2847_s9 + $0x80] sm:$0xff] }
 0x134   :  { %v640_v30 = vpop.f32.mrf.mxu1  ;;  %1039 = vmatpush.bf16.msra.mxu2 %v1934_v23  ;;  %v2296_v23 = vld [vmem:[%s2847_s9 + $0xc8] sm:$0xff] }
 0x135   :  { %v668_v31 = vmax.f32 %v613_v29, 0.0  ;;  %v1946_v29 = vor.u32 %v2248_v27, %v1943_v28  ;;  %1065 = vmatpush.bf16.msrb.mxu0 %v1942_v8  ;;  %v1917_v30 = vld [vmem:[%s2845_s7 + $0x20] sm:$0xf]  ;;  %v2272_v8 = vld [vmem:[%s2847_s9 + $0x8] sm:$0xff] }
 0x136   :  { %v2295_v27 = vld [vmem:[%s2847_s9 + $0xc0] sm:$0xff]  ;;  %v2280_v28 = vld [vmem:[%s2847_s9 + $0x48] sm:$0xff] }
 0x137   :  { %v670_v33 = vpack.c.bf16 %v668_v31, %v668_v31  ;;  %v601_v34 = vpop.f32.mrf.mxu2  ;;  %v2245_v31 = vld [vmem:[%s2845_s7 + $0x2c] sm:$0xf0]  ;;  %1078 = vmatpush.bf16.msrb.mxu1 %v1946_v29  ;;  %v2271_v29 = vld [vmem:[%s2847_s9] sm:$0xff] }
 0x138   :  { %v1919_v34 = vld [vmem:[%s2845_s7 + $0x30] sm:$0xf0] }
 0x139   :  { %812 = vmatmul.bf16.vlgmr.msra.gmra.mxu0 %v670_v33  ;;  %v1918_v33 = vor.u32 %v2245_v31, %v1917_v30  ;;  %v2279_v30 = vld [vmem:[%s2847_s9 + $0x40] sm:$0xff] }
 0x13a   :  { %v614_v35 = vpop.f32.mrf.mxu3  ;;  %v864_v31 = vld [vmem:[%s2846_s8] sm:$0xf] }
 0x13b   :  { %v1925_v35 = vld [vmem:[%s2845_s7 + $0x28] sm:$0xf]  ;;  %1040 = vmatpush.bf16.msra.mxu2 %v1918_v33  ;;  %v869_v33 = vperm.slane %v864_v31, 3 }
 0x13f   :  { %v651_v38 = vpop.f32.mrf.mxu2 }
 0x140   :  { %v652_v39 = vadd.f32 %v651_v38, %v639_v37  ;;  %v1922_v37 = vor.u32 %v2243_v32, %v1919_v34  ;;  %v1926_v38 = vor.u32 %v2246_v36, %v1925_v35  ;;  %v868_v32 = vperm.slane %v864_v31, 2 }
 0x142   :  { %v664_v40 = vpop.f32.mrf.mxu3  ;;  %1053 = vmatpush.bf16.msra.mxu3 %v1922_v37  ;;  %1066 = vmatpush.bf16.msrb.mxu0 %v1926_v38  ;;  %v866_v38 = vperm.slane %v864_v31, 0 }
 0x143   :  { %v665_v41 = vadd.f32 %v664_v40, %v652_v39  ;;  %v2244_v39 = vld [vmem:[%s2845_s7 + $0x2c] sm:$0xf]  ;;  %v1927_v40 = vld [vmem:[%s2845_s7 + $0x38] sm:$0xf0] }
 0x145   :  { %v669_v42 = vmax.f32 %v665_v41, 0.0  ;;  %v1930_v41 = vor.u32 %v2244_v39, %v1927_v40  ;;  %v867_v39 = vperm.slane %v864_v31, 1 }
 0x146   :  { %1067 = vmatpush.bf16.msrb.mxu0 %v1910_v50 }
 0x147   :  { %v671_v43 = vpack.c.bf16 %v669_v42, %v669_v42  ;;  %v653_v44 = vpop.f32.mrf.mxu2  ;;  %v1901_v42 = vld [vmem:[%s2845_s7] sm:$0xf]  ;;  %1079 = vmatpush.bf16.msrb.mxu1 %v1930_v41 }
 0x148   :  { %v2239_v44 = vld [vmem:[%s2845_s7 + $0x4] sm:$0xf] }
 0x149   :  { %825 = vmatmul.bf16.vlgmr.msra.gmra.mxu1 %v671_v43  ;;  %v2241_v43 = vld [vmem:[%s2845_s7 + $0xc] sm:$0xf0]  ;;  %v1906_v49 = vor.u32 %v2239_v44, %v1903_v46 }
 0x14a   :  { %v666_v45 = vpop.f32.mrf.mxu3  ;;  %1380 = vmatpush.bf16.msra.mxu0 %v2294_v54 }
 0x14b   :  { %v1902_v45 = vor.u32 %v2241_v43, %v1901_v42  ;;  %1054 = vmatpush.bf16.msra.mxu3 %v1906_v49  ;;  %1080 = vmatpush.bf16.msrb.mxu1 %v1914_v53 }
 0x14d   :  { %1041 = vmatpush.bf16.msra.mxu2 %v1902_v45 }
 0x14e   :  { %1381 = vmatpush.bf16.msra.mxu0 %v2293_v58 }
 0x14f   :  { %1393 = vmatpush.bf16.msra.mxu1 %v2302_v55  ;;  %1367 = vmatpush.bf16.msrb.mxu3 %v2286_v57 }
 0x151   :  { %1354 = vmatpush.bf16.msrb.mxu2 %v2278_v56 }
 0x152   :  { %1382 = vmatpush.bf16.msra.mxu0 %v2292_v62 }
 0x153   :  { %1394 = vmatpush.bf16.msra.mxu1 %v2301_v59  ;;  %1368 = vmatpush.bf16.msrb.mxu3 %v2285_v61 }
 0x155   :  { %1355 = vmatpush.bf16.msrb.mxu2 %v2277_v60  ;;  %v2317_v60 = vld [vmem:[%s2848_s10] ss:$0 sm:$0xff]  ;;  %s2398_s10 = smov 16  }
 0x156   :  { %1383 = vmatpush.bf16.msra.mxu0 %v2291_v3 }
 0x157   :  { %1395 = vmatpush.bf16.msra.mxu1 %v2300_v63  ;;  %1369 = vmatpush.bf16.msrb.mxu3 %v2284_v1 }
 0x159   :  { %1356 = vmatpush.bf16.msrb.mxu2 %v2276_v0 }
 0x15a   :  { %1384 = vmatpush.bf16.msra.mxu0 %v2290_v7 }
 0x15b   :  { %1396 = vmatpush.bf16.msra.mxu1 %v2299_v4  ;;  %1370 = vmatpush.bf16.msrb.mxu3 %v2283_v6 }
 0x15d   :  { %1357 = vmatpush.bf16.msrb.mxu2 %v2275_v5 }
 0x15e   :  { %1385 = vmatpush.bf16.msra.mxu0 %v2289_v13 }
 0x15f   :  { %1397 = vmatpush.bf16.msra.mxu1 %v2298_v9  ;;  %1371 = vmatpush.bf16.msrb.mxu3 %v2282_v11 }
 0x161   :  { %1358 = vmatpush.bf16.msrb.mxu2 %v2274_v10 }
 0x162   :  { %1386 = vmatpush.bf16.msra.mxu0 %v2288_v22 }
 0x163   :  { %1398 = vmatpush.bf16.msra.mxu1 %v2297_v14  ;;  %1372 = vmatpush.bf16.msrb.mxu3 %v2281_v25 }
 0x165   :  { %1359 = vmatpush.bf16.msrb.mxu2 %v2273_v24 }
 0x166   :  { %1387 = vmatpush.bf16.msra.mxu0 %v2287_v26 }
 0x167   :  { %1399 = vmatpush.bf16.msra.mxu1 %v2296_v23  ;;  %1373 = vmatpush.bf16.msrb.mxu3 %v2280_v28 }
 0x169   :  { %1360 = vmatpush.bf16.msrb.mxu2 %v2272_v8 }
 0x16b   :  { %1400 = vmatpush.bf16.msra.mxu1 %v2295_v27  ;;  %1374 = vmatpush.bf16.msrb.mxu3 %v2279_v30  ;;  %v2318_v27 = vld [vmem:[%s2849_s11] ss:$0 sm:$0xff]  ;;  %s2399_s11 = smov 96  }
 0x16d   :  { %1361 = vmatpush.bf16.msrb.mxu2 %v2271_v29 }
 0x1b6   :  { %v813_v2 = vpop.f32.mrf.mxu0 }
 0x1b7   :  { %v814_v16 = vadd.f32 %v2316_v15, %v813_v2 }
 0x1be   :  { %v815_v12 = vpop.f32.mrf.mxu0 }
 0x1c6   :  { %v826_v17 = vpop.f32.mrf.mxu1 }
 0x1c7   :  { %v827_v18 = vadd.f32 %v826_v17, %v814_v16 }
 0x1c9   :  { %v830_v19 = vmax.f32 %v827_v18, 0.0 }
 0x1cb   :  { %v831_v20 = vpack.c.bf16 %v830_v19, %v830_v19 }
 0x1cd   :  { %1042 = vmatmul.bf16.vlgmr.msra.gmra.mxu2 %v831_v20  ;;  %1055 = vmatmul.bf16.vlgmr.msra.gmra.mxu3 %v831_v20 }
 0x1ce   :  { %1068 = vmatmul.bf16.vlgmr.msrb.gmra.mxu0 %v831_v20  ;;  %1081 = vmatmul.bf16.vlgmr.msrb.gmra.mxu1 %v831_v20  ;;  %v828_v21 = vpop.f32.mrf.mxu1 }
 0x24b   :  { %v1069_v34 = vpop.f32.mrf.mxu0  ;;  %v1082_v35 = vpop.f32.mrf.mxu1 }
 0x24c   :  { %v1070_v36 = vadd.f32 %v1069_v34, %v868_v32  ;;  %v1083_v37 = vadd.f32 %v1082_v35, %v869_v33 }
 0x24e   :  { %v1088_v40 = vmax.f32 %v1070_v36, 0.0  ;;  %v1089_v41 = vmax.f32 %v1083_v37, 0.0 }
 0x250   :  { %v1092_v42 = vpack.c.bf16 %v1088_v40, %v1088_v40  ;;  %v1093_v43 = vpack.c.bf16 %v1089_v41, %v1089_v41  ;;  %v1043_v44 = vpop.f32.mrf.mxu2  ;;  %v1056_v45 = vpop.f32.mrf.mxu3 }
 0x251   :  { %v1044_v46 = vadd.f32 %v1043_v44, %v866_v38  ;;  %v1057_v47 = vadd.f32 %v1056_v45, %v867_v39 }
 0x252   :  { %1388 = vmatmul.bf16.vlgmr.msra.gmra.mxu0 %v1092_v42  ;;  %1401 = vmatmul.bf16.vlgmr.msra.gmra.mxu1 %v1093_v43 }
 0x253   :  { %v1086_v48 = vmax.f32 %v1044_v46, 0.0  ;;  %v1087_v49 = vmax.f32 %v1057_v47, 0.0  ;;  %v1071_v50 = vpop.f32.mrf.mxu0  ;;  %v1084_v51 = vpop.f32.mrf.mxu1 }
 0x255   :  { %v1090_v52 = vpack.c.bf16 %v1086_v48, %v1086_v48  ;;  %v1091_v53 = vpack.c.bf16 %v1087_v49, %v1087_v49 }
 0x257   :  { %1362 = vmatmul.bf16.vlgmr.msrb.gmra.mxu2 %v1090_v52  ;;  %1375 = vmatmul.bf16.vlgmr.msrb.gmra.mxu3 %v1091_v53 }
 0x258   :  { %v1045_v54 = vpop.f32.mrf.mxu2  ;;  %v1058_v55 = vpop.f32.mrf.mxu3 }
 0x2cf   :  { %v1389_v56 = vpop.f32.mrf.mxu0  ;;  %v1402_v57 = vpop.f32.mrf.mxu1 }
 0x2d7   :  { %v1391_v58 = vpop.f32.mrf.mxu0  ;;  %v1404_v59 = vpop.f32.mrf.mxu1 }
 0x2da   :  { %v1363_v61 = vpop.f32.mrf.mxu2  ;;  %v1376_v62 = vpop.f32.mrf.mxu3 }
 0x2db   :  { %v1364_v63 = vadd.f32 %v2317_v60, %v1363_v61 }
 0x2dd   :  { %v1377_v0 = vadd.f32 %v1376_v62, %v1364_v63 }
 0x2df   :  { %v1390_v1 = vadd.f32 %v1389_v56, %v1377_v0 }
 0x2e1   :  { %v1403_v2 = vadd.f32 %v1402_v57, %v1390_v1 }
 0x2e2   :  { %v1365_v3 = vpop.f32.mrf.mxu2  ;;  %v1378_v4 = vpop.f32.mrf.mxu3 }
 0x2e3   :  { %1426 = vrot.lane.b32.xlu2 %v1403_v2, %s2393_s4  ;;  %1415 = vrot.lane.b32.xlu1 %v1403_v2, %s2394_s23 }
 0x2e4   :  { %1407 = vrot.lane.b32.xlu0 %v1403_v2, %s2395_s24 }
 0x2eb   :  { %1461 = vrot.lane.b32.xlu2 %v1403_v2, %s2396_s25 }
 0x2ec   :  { %1411 = vrot.lane.b32.xlu0 %v1403_v2, %s2397_s26 }
 0x2f4   :  { %1489 = vrot.lane.b32.xlu0 %v1403_v2, %s2398_s10 }
 0x33d   :  { %v1427_v13 = vpop.permute.xlu2 %1426 }
 0x345   :  { %v1462_v16 = vpop.permute.xlu2 %1461 }
 0x355   :  { %v1416_v10 = vpop.permute.xlu1 %1415 }
 0x356   :  { %v1408_v5 = vpop.permute.xlu0 %1407 }
 0x357   :  { %v1410_v6 = vadd.f32 %v1408_v5, %v1403_v2 }
 0x35e   :  { %v1412_v7 = vpop.permute.xlu0 %1411 }
 0x35f   :  { %v1414_v9 = vadd.f32 %v1412_v7, %v1410_v6 }
 0x361   :  { %v1418_v11 = vadd.f32 %v1416_v10, %v1414_v9 }
 0x363   :  { %v1419_v12 = vmul.f32 0.25, %v1418_v11 }
 0x365   :  { %1421 = vrot.lane.b32.xlu1 %v1419_v12, %s2393_s4 }
 0x366   :  { %v1490_v17 = vpop.permute.xlu0 %1489 }
 0x36d   :  { %1517 = vrot.lane.b32.xlu1 %v1403_v2, %s2389_s30 }
 0x3d7   :  { %v1422_v14 = vpop.permute.xlu1 %1421 }
 0x3d8   :  { %v1424_v15 = vsub.f32 %v1403_v2, %v1422_v14 }
 0x3da   :  { %v1464_v18 = vadd.f32 %v1462_v16, %v1424_v15  ;;  %v1429_v19 = vadd.f32 %v1427_v13, %v1424_v15  ;;  %v1492_v20 = vadd.f32 %v1490_v17, %v1424_v15 }
 0x3dc   :  { %v1465_v21 = vsel %vm1430_vm1, %v1464_v18, -inf  ;;  %v1431_v22 = vsel %vm1430_vm1, %v1429_v19, -inf  ;;  %v1493_v23 = vsel %vm1430_vm1, %v1492_v20, -inf }
 0x3dd   :  { %1466 = vmax.xlane.f32.xlu0 %v1465_v21  ;;  %1432 = vmax.xlane.f32.xlu2 %v1431_v22 }
 0x3de   :  { %1494 = vmax.xlane.f32.xlu1 %v1493_v23 }
 0x3df   :  { %v1518_v24 = vpop.permute.xlu1 %1517 }
 0x3e0   :  { %v1520_v25 = vadd.f32 %v1518_v24, %v1424_v15 }
 0x3e2   :  { %v1521_v26 = vsel %vm1430_vm1, %v1520_v25, -inf }
 0x3e5   :  { %1522 = vmax.xlane.f32.xlu2 %v1521_v26 }
 0x3f7   :  { %1450 = vrot.lane.b32.xlu1 %v2318_v27, %s2393_s4 }
 0x450   :  { %v1433_v8 = vpop.xlane.xlu2 %1432  ;;  %v1467_v28 = vpop.xlane.xlu0 %1466 }
 0x451   :  { %v1434_v29 = vsub.f32 %v1429_v19, %v1433_v8  ;;  %v1495_v30 = vpop.xlane.xlu1 %1494  ;;  %v1468_v31 = vsub.f32 %v1464_v18, %v1467_v28 }
 0x452   :  { %v1496_v32 = vsub.f32 %v1492_v20, %v1495_v30 }
 0x453   :  { %v1435_v33 = vmul.f32 1.442695, %v1434_v29  ;;  %v1469_v34 = vmul.f32 1.442695, %v1468_v31 }
 0x454   :  { %v1497_v35 = vmul.f32 1.442695, %v1496_v32 }
 0x455   :  { %2319 = vpow2.f32 %v1435_v33 }
 0x456   :  { %2321 = vpow2.f32 %v1497_v35 }
 0x457   :  { %2323 = vpow2.f32 %v1469_v34 }
 0x458   :  { %v1523_v36 = vpop.xlane.xlu2 %1522 }
 0x459   :  { %v1524_v37 = vsub.f32 %v1520_v25, %v1523_v36 }
 0x45b   :  { %v2320_v38 = vpop.eup %2319  ;;  %v1525_v39 = vmul.f32 1.442695, %v1524_v37 }
 0x45c   :  { %v2322_v40 = vpop.eup %2321  ;;  %1438 = vrot.lane.b32.xlu2 %v2320_v38, %s2399_s11 }
 0x45d   :  { %v2324_v41 = vpop.eup %2323  ;;  %2325 = vpow2.f32 %v1525_v39  ;;  %1500 = vrot.lane.b32.xlu0 %v2322_v40, %s2399_s11 }
 0x45e   :  { %1472 = vrot.lane.b32.xlu1 %v2324_v41, %s2399_s11 }
 0x463   :  { %v2326_v42 = vpop.eup %2325 }
 0x466   :  { %1528 = vrot.lane.b32.xlu1 %v2326_v42, %s2399_s11 }
 0x469   :  { %v1451_v45 = vpop.permute.xlu1 %1450 }
 0x4b6   :  { %v1439_v43 = vpop.permute.xlu2 %1438 }
 0x4b7   :  { %v1442_v44 = vsel %vm1441_vm2, %v1439_v43, 0.0 }
 0x4b8   :  { %1443 = vadd.xlane.f32.xlu0 %v1442_v44 }
 0x4cf   :  { %v1501_v46 = vpop.permute.xlu0 %1500 }
 0x4d0   :  { %v1473_v47 = vpop.permute.xlu1 %1472  ;;  %v1503_v48 = vsel %vm1441_vm2, %v1501_v46, 0.0 }
 0x4d1   :  { %v1475_v49 = vsel %vm1441_vm2, %v1473_v47, 0.0  ;;  %1504 = vadd.xlane.f32.xlu2 %v1503_v48 }
 0x4d2   :  { %1476 = vadd.xlane.f32.xlu0 %v1475_v49 }
 0x4d8   :  { %v1529_v50 = vpop.permute.xlu1 %1528 }
 0x4d9   :  { %v1531_v51 = vsel %vm1441_vm2, %v1529_v50, 0.0 }
 0x4da   :  { %1532 = vadd.xlane.f32.xlu2 %v1531_v51 }
 0x52b   :  { %v1444_v52 = vpop.xlane.xlu0 %1443 }
 0x52c   :  { %2327 = vrcp.f32 %v1444_v52 }
 0x532   :  { %v2328_v53 = vpop.eup %2327 }
 0x533   :  { %v1446_v54 = vmul.f32 %v2328_v53, %v2320_v38 }
 0x535   :  { %v1447_v55 = vmax.f32 %v1446_v54, 0.001 }
 0x537   :  { %v1453_v56 = vmul.f32 %v1451_v45, %v1447_v55 }
 0x539   :  { %1455 = vrot.lane.b32.xlu0 %v1453_v56, %s2399_s11 }
 0x544   :  { %v1505_v57 = vpop.xlane.xlu2 %1504 }
 0x545   :  { %2329 = vrcp.f32 %v1505_v57  ;;  %v1477_v58 = vpop.xlane.xlu0 %1476 }
 0x546   :  { %2331 = vrcp.f32 %v1477_v58 }
 0x54b   :  { %v2330_v59 = vpop.eup %2329 }
 0x54c   :  { %v2332_v60 = vpop.eup %2331  ;;  %v1507_v61 = vmul.f32 %v2330_v59, %v2322_v40 }
 0x54d   :  { %v1479_v62 = vmul.f32 %v2332_v60, %v2324_v41  ;;  %v1533_v10 = vpop.xlane.xlu2 %1532 }
 0x54e   :  { %v1508_v63 = vmax.f32 %v1507_v61, 0.001  ;;  %2333 = vrcp.f32 %v1533_v10 }
 0x54f   :  { %v1480_v0 = vmax.f32 %v1479_v62, 0.001 }
 0x550   :  { %v1509_v1 = vmul.f32 %v1508_v63, %v1451_v45 }
 0x551   :  { %v1481_v2 = vmul.f32 %v1480_v0, %v1451_v45 }
 0x552   :  { %1511 = vrot.lane.b32.xlu0 %v1509_v1, %s2399_s11 }
 0x553   :  { %1483 = vrot.lane.b32.xlu1 %v1481_v2, %s2399_s11 }
 0x554   :  { %v2334_v11 = vpop.eup %2333 }
 0x555   :  { %v1535_v12 = vmul.f32 %v2334_v11, %v2326_v42 }
 0x557   :  { %v1536_v13 = vmax.f32 %v1535_v12, 0.001 }
 0x559   :  { %v1537_v14 = vmul.f32 %v1536_v13, %v1451_v45 }
 0x5ab   :  { %v1456_v3 = vpop.permute.xlu0 %1455 }
 0x5ac   :  { %v1458_v4 = vsel %vm1441_vm2, %v1456_v3, 0.0 }
 0x5ad   :  { %1459 = vadd.xlane.f32.xlu2 %v1458_v4 }
 0x5c4   :  { %v1512_v5 = vpop.permute.xlu0 %1511 }
 0x5c5   :  { %v1484_v6 = vpop.permute.xlu1 %1483  ;;  %v1514_v7 = vsel %vm1441_vm2, %v1512_v5, 0.0 }
 0x5c6   :  { %v1486_v9 = vsel %vm1441_vm2, %v1484_v6, 0.0  ;;  %1515 = vadd.xlane.f32.xlu2 %v1514_v7 }
 0x5c7   :  { %1487 = vadd.xlane.f32.xlu1 %v1486_v9 }
 0x5de   :  { %1539 = vrot.lane.b32.xlu2 %v1537_v14, %s2399_s11 }
 0x620   :  { %v1460_v15 = vpop.xlane.xlu2 %1459 }
 0x639   :  { %v1516_v16 = vpop.xlane.xlu2 %1515 }
 0x63a   :  { %v1488_v17 = vpop.xlane.xlu1 %1487 }
 0x63b   :  { %v1546_v18 = vsel %vm1545_vm3, %v1460_v15, %v1488_v17 }
 0x63c   :  { %v1548_v19 = vsel %vm1547_vm4, %v1546_v18, %v1516_v16 }
 0x641   :  { %v1540_v20 = vpop.permute.xlu2 %1539 }
 0x642   :  { %v1542_v21 = vsel %vm1441_vm2, %v1540_v20, 0.0 }
 0x643   :  { %1543 = vadd.xlane.f32.xlu1 %v1542_v21 }
 0x6b6   :  { %v1544_v22 = vpop.xlane.xlu1 %1543 }
 0x6b7   :  { %v1550_v23 = vsel %vm1549_vm5, %v1548_v19, %v1544_v22 }
 0x6b8   :  { %1552 = vst.msk [vmem:[%s2850_s12] sm:$0xff] %vm1551_vm6, %v1550_v23 }
 0x6b9   :  { %1557 = vsyncpa [#allocation3], 1 }
 0x6ba   :  { %1558 = vsyncpa [#allocation5], 1 }

</bundles_post_ra>
